<compile_context>
chip_gen: v6e
topology: v6e:2x2x1
jax: 0.10.0
libtpu: 0.0.40
codegen_flags: <defaults>
</compile_context>

<pallas_src>
import functools
import math

import jax
import jax.numpy as jnp
import numpy as np
from jax import lax
from jax.experimental import pallas as pl
from jax.experimental.pallas import tpu as pltpu

_EPS = 1e-5


def _layer_norm(x, gamma, beta, eps=_EPS):
    mu = jnp.mean(x, axis=-1, keepdims=True)
    xc = x - mu
    var = jnp.mean(xc * xc, axis=-1, keepdims=True)
    inv = lax.rsqrt(var + eps)
    return xc * inv * gamma + beta


def _detr_encoder_kernel(src_ref, pos_ref,
                         wq_ref, wk_ref, wv_ref, wo_ref, w1_ref, w2_ref,
                         vecd_ref, b1_ref,
                         out_ref, attn_ref,
                         x_scr, ctx_scr, *, num_heads, batch, seq):
    layer = pl.program_id(0)
    last = pl.num_programs(0) - 1

    @pl.when(layer == 0)
    def _():
        # Load input activations into the resident f32 carry once.
        x_scr[...] = src_ref[...].astype(jnp.float32)

    M, D = x_scr.shape
    B, S, H = batch, seq, num_heads
    dh = D // H
    scale = 1.0 / math.sqrt(dh)
    inv_h = 1.0 / H

    # Layer-l parameters (leading block dim is 1 -> index [0]).
    wq, wk, wv, wo = wq_ref[0], wk_ref[0], wv_ref[0], wo_ref[0]   # (D, D)
    w1, w2 = w1_ref[0], w2_ref[0]                                 # (D,F),(F,D)
    vec = vecd_ref[0]                                             # (9, D)
    bq, bk, bv, bo = vec[0:1], vec[1:2], vec[2:3], vec[3:4]
    g1, be1, g2, be2 = vec[4:5], vec[5:6], vec[6:7], vec[7:8]
    b2 = vec[8:9]
    b1 = b1_ref[0]                                                # (1, F)

    x = x_scr[...]                                  # (M, D) f32 carry
    pos = pos_ref[...].astype(jnp.float32)
    qk_in = x + pos                                 # DETR: pos added to Q/K only

    # Batched (M = B*S rows) projections, default precision, f32 accumulation.
    q = jnp.dot(qk_in, wq, preferred_element_type=jnp.float32) + bq
    k = jnp.dot(qk_in, wk, preferred_element_type=jnp.float32) + bk
    v = jnp.dot(x, wv, preferred_element_type=jnp.float32) + bv

    # Per-(batch, head) score/softmax/context; contexts land in a (M, D) slab.
    for b in range(B):                              # small static loops
        r0 = b * S
        for h in range(H):
            c0 = h * dh
            q_bh = q[r0:r0 + S, c0:c0 + dh] * scale
            k_bh = k[r0:r0 + S, c0:c0 + dh]
            v_bh = v[r0:r0 + S, c0:c0 + dh]
            s_bh = lax.dot_general(q_bh, k_bh, (((1,), (1,)), ((), ())),
                                   preferred_element_type=jnp.float32)  # (S,S)
            m = jnp.max(s_bh, axis=-1, keepdims=True)
            e = jnp.exp(s_bh - m)
            denom = jnp.sum(e, axis=-1, keepdims=True)
            p = e * pl.reciprocal(denom, approx=True)
            ctx_scr[r0:r0 + S, c0:c0 + dh] = jnp.dot(
                p, v_bh, preferred_element_type=jnp.float32)

            # Head-averaged attention weights are only observable for the last
            # layer -> skip the bookkeeping on all earlier layers.
            @pl.when(layer == last)
            def _(p=p, b=b, h=h):
                if h == 0:
                    attn_ref[b] = (p * inv_h).astype(attn_ref.dtype)
                else:
                    attn_ref[b] = attn_ref[b] + (p * inv_h).astype(attn_ref.dtype)

    # Single full-K output projection over the whole (M, D) context slab.
    o = jnp.dot(ctx_scr[...], wo, preferred_element_type=jnp.float32) + bo
    x1 = _layer_norm(x + o, g1, be1)

    f = jnp.dot(x1, w1, preferred_element_type=jnp.float32) + b1
    f = jnp.maximum(f, 0.0)
    f = jnp.dot(f, w2, preferred_element_type=jnp.float32) + b2
    x2 = _layer_norm(x1 + f, g2, be2)

    x_scr[...] = x2                                 # carry to next layer

    @pl.when(layer == last)
    def _():
        out_ref[...] = x2.astype(out_ref.dtype)     # only the final output is stored


def detr_transformer_encoder(src, pos, params, *, num_heads):
    """src, pos: (S, B, D) (PyTorch seq-first). Returns (out (S,B,D), attn (B,S,S))."""
    S, B, D = src.shape
    L = params["wq"].shape[0]
    F = params["w1"].shape[-1]
    assert D % num_heads == 0, "d_model must be divisible by num_heads"
    M = B * S

    x2d = jnp.transpose(src, (1, 0, 2)).reshape(M, D)
    p2d = jnp.transpose(pos, (1, 0, 2)).reshape(M, D)

    # Pack the 9 per-layer D-sized vectors -> one (L, 9, D) tensor (fewer DMAs).
    vecd = jnp.concatenate([
        params["bq"], params["bk"], params["bv"], params["bo"],
        params["ln1g"], params["ln1b"], params["ln2g"], params["ln2b"],
        params["b2"],
    ], axis=1)

    kernel = functools.partial(_detr_encoder_kernel, num_heads=num_heads,
                               batch=B, seq=S)

    res2 = lambda l: (0, 0)              # resident activations / outputs
    res3 = lambda l: (0, 0, 0)
    per_layer = lambda l: (l, 0, 0)      # layer-l weights, pipelined

    # Advisory cost + explicit VMEM budget (resident activations + 2x layer wts).
    flops = 2 * L * M * (4 * D * D + 2 * D * F) + 4 * L * B * num_heads * S * S * (D // num_heads)
    act_bytes = (5 * M * D + B * S * S) * 4
    w_layer_bytes = (4 * D * D + 2 * D * F + 9 * D + F) * 4
    w_bytes = L * w_layer_bytes
    est = act_bytes + 2 * w_layer_bytes
    vmem_limit = int(min(max(2 * est, 32 << 20), 100 << 20))   # cap lower on v7x
    cost = pl.CostEstimate(
        flops=int(flops),
        transcendentals=int(L * B * num_heads * S * S),
        bytes_accessed=int(w_bytes + act_bytes),
    )

    out2d, attn = pl.pallas_call(
        kernel,
        out_shape=(jax.ShapeDtypeStruct((M, D), src.dtype),
                   jax.ShapeDtypeStruct((B, S, S), jnp.float32)),
        grid_spec=pltpu.PrefetchScalarGridSpec(
            num_scalar_prefetch=0,
            grid=(L,),
            in_specs=[
                pl.BlockSpec((M, D), res2),          # src (flattened B*S)
                pl.BlockSpec((M, D), res2),          # pos
                pl.BlockSpec((1, D, D), per_layer),  # wq
                pl.BlockSpec((1, D, D), per_layer),  # wk
                pl.BlockSpec((1, D, D), per_layer),  # wv
                pl.BlockSpec((1, D, D), per_layer),  # wo
                pl.BlockSpec((1, D, F), per_layer),  # w1
                pl.BlockSpec((1, F, D), per_layer),  # w2
                pl.BlockSpec((1, 9, D), per_layer),  # packed bias / LN vectors
                pl.BlockSpec((1, 1, F), per_layer),  # b1
            ],
            out_specs=[
                pl.BlockSpec((M, D), res2),          # encoder output (last layer)
                pl.BlockSpec((B, S, S), res3),       # last-layer attn weights
            ],
            scratch_shapes=[pltpu.VMEM((M, D), jnp.float32),    # activation carry
                            pltpu.VMEM((M, D), jnp.float32)],   # per-head ctx slab
        ),
        compiler_params=pltpu.CompilerParams(
            dimension_semantics=("arbitrary",),      # layers are sequential
            vmem_limit_bytes=vmem_limit),
        cost_estimate=cost,
    )(x2d, p2d,
      params["wq"], params["wk"], params["wv"], params["wo"],
      params["w1"], params["w2"], vecd, params["b1"])

    out = jnp.transpose(out2d.reshape(B, S, D), (1, 0, 2))
    return out, attn


def detr_transformer_encoder_ref(src, pos, params, *, num_heads):
    """Pure-JAX reference reproducing the PyTorch forward (inference)."""
    S, B, D = src.shape
    H = num_heads
    dh = D // H
    L = params["wq"].shape[0]

    x = jnp.transpose(src, (1, 0, 2)).astype(jnp.float32)   # (B, S, D)
    p = jnp.transpose(pos, (1, 0, 2)).astype(jnp.float32)
    attn = None
    for l in range(L):
        wq, bq = params["wq"][l], params["bq"][l]
        wk, bk = params["wk"][l], params["bk"][l]
        wv, bv = params["wv"][l], params["bv"][l]
        wo, bo = params["wo"][l], params["bo"][l]
        g1, be1 = params["ln1g"][l], params["ln1b"][l]
        g2, be2 = params["ln2g"][l], params["ln2b"][l]
        w1, b1 = params["w1"][l], params["b1"][l]
        w2, b2 = params["w2"][l], params["b2"][l]

        qk_in = x + p
        q = jnp.einsum("bsd,de->bse", qk_in, wq) + bq
        k = jnp.einsum("bsd,de->bse", qk_in, wk) + bk
        v = jnp.einsum("bsd,de->bse", x, wv) + bv

        q = q.reshape(B, S, H, dh).transpose(0, 2, 1, 3) / math.sqrt(dh)
        k = k.reshape(B, S, H, dh).transpose(0, 2, 1, 3)
        v = v.reshape(B, S, H, dh).transpose(0, 2, 1, 3)

        s = jnp.einsum("bhqd,bhkd->bhqk", q, k)
        s = s - jnp.max(s, axis=-1, keepdims=True)
        e = jnp.exp(s)
        probs = e / jnp.sum(e, axis=-1, keepdims=True)       # (B, H, S, S)
        attn = jnp.mean(probs, axis=1)                       # avg over heads
        ctx = jnp.einsum("bhqk,bhkd->bhqd", probs, v)
        ctx = ctx.transpose(0, 2, 1, 3).reshape(B, S, D)

        o = jnp.einsum("bsd,de->bse", ctx, wo) + bo
        x = _layer_norm(x + o, g1, be1)

        f = jnp.einsum("bsd,df->bsf", x, w1) + b1
        f = jnp.maximum(f, 0.0)
        f = jnp.einsum("bsf,fd->bsd", f, w2) + b2
        x = _layer_norm(x + f, g2, be2)

    return jnp.transpose(x, (1, 0, 2)).astype(src.dtype), attn


def init_params(key, num_layers, d_model, dim_ff, dtype=jnp.float32):
    L, D, F = num_layers, d_model, dim_ff
    ks = jax.random.split(key, 16)

    def nrm(k, shape, scale):
        return jax.random.normal(k, shape, dtype) * scale

    s_d = 1.0 / math.sqrt(D)
    s_f = 1.0 / math.sqrt(F)
    return dict(
        wq=nrm(ks[0], (L, D, D), s_d), bq=nrm(ks[1], (L, 1, D), 0.02),
        wk=nrm(ks[2], (L, D, D), s_d), bk=nrm(ks[3], (L, 1, D), 0.02),
        wv=nrm(ks[4], (L, D, D), s_d), bv=nrm(ks[5], (L, 1, D), 0.02),
        wo=nrm(ks[6], (L, D, D), s_d), bo=nrm(ks[7], (L, 1, D), 0.02),
        ln1g=1.0 + nrm(ks[8], (L, 1, D), 0.05), ln1b=nrm(ks[9], (L, 1, D), 0.05),
        ln2g=1.0 + nrm(ks[10], (L, 1, D), 0.05), ln2b=nrm(ks[11], (L, 1, D), 0.05),
        w1=nrm(ks[12], (L, D, F), s_d), b1=nrm(ks[13], (L, 1, F), 0.02),
        w2=nrm(ks[14], (L, F, D), s_f), b2=nrm(ks[15], (L, 1, D), 0.02),
    )


if __name__ == "__main__":
    key = jax.random.PRNGKey(0)
    S, B, D, H, F, L = 8, 2, 32, 4, 64, 2      # seq, batch, d_model, heads, ffn, layers

    k_src, k_pos, k_par = jax.random.split(key, 3)
    src = jax.random.normal(k_src, (S, B, D), dtype=jnp.float32)
    pos = jax.random.normal(k_pos, (S, B, D), dtype=jnp.float32) * 0.1
    params = init_params(k_par, L, D, F)

    out, attn = detr_transformer_encoder(src, pos, params, num_heads=H)
    out = jax.block_until_ready(out)
    attn = jax.block_until_ready(attn)

    ref_out, ref_attn = detr_transformer_encoder_ref(src, pos, params, num_heads=H)

    assert out.shape == (S, B, D), out.shape
    assert attn.shape == (B, S, S), attn.shape
    assert out.dtype == src.dtype
    # Default (bf16-input, f32-accumulate) MXU precision + approx reciprocal in
    # the kernel softmax -> compare with a loose-ish tolerance.
    np.testing.assert_allclose(np.asarray(out), np.asarray(ref_out),
                               rtol=2e-2, atol=2e-2)
    np.testing.assert_allclose(np.asarray(attn), np.asarray(ref_attn),
                               rtol=2e-2, atol=2e-2)
    print("KERNEL_OK")
</pallas_src>

<mosaic_0001>
module attributes {stable_mosaic.version = 11 : i64} {
  func.func @_detr_encoder_kernel(%arg0: i32, %arg1: memref<16x32xf32, #tpu.memory_space<vmem>>, %arg2: memref<16x32xf32, #tpu.memory_space<vmem>>, %arg3: memref<1x32x32xf32, #tpu.memory_space<vmem>>, %arg4: memref<1x32x32xf32, #tpu.memory_space<vmem>>, %arg5: memref<1x32x32xf32, #tpu.memory_space<vmem>>, %arg6: memref<1x32x32xf32, #tpu.memory_space<vmem>>, %arg7: memref<1x32x64xf32, #tpu.memory_space<vmem>>, %arg8: memref<1x64x32xf32, #tpu.memory_space<vmem>>, %arg9: memref<1x9x32xf32, #tpu.memory_space<vmem>>, %arg10: memref<1x1x64xf32, #tpu.memory_space<vmem>>, %arg11: memref<16x32xf32, #tpu.memory_space<vmem>>, %arg12: memref<2x8x8xf32, #tpu.memory_space<vmem>>, %arg13: memref<16x32xf32, #tpu.memory_space<vmem>>, %arg14: memref<16x32xf32, #tpu.memory_space<vmem>>) attributes {dimension_semantics = [#tpu.dimension_semantics<arbitrary>], iteration_bounds = array<i64: 2>, scalar_prefetch = 0 : i64, scratch_operands = 2 : i64, tpu.core_type = #tpu.core_type<tc>, window_params = [{pipeline_mode = #tpu.pipeline_mode<synchronous>, transform_indices = @transform_0, window_bounds = array<i64: 16, 32>}, {pipeline_mode = #tpu.pipeline_mode<synchronous>, transform_indices = @transform_1, window_bounds = array<i64: 16, 32>}, {transform_indices = @transform_2, window_bounds = array<i64: 1, 32, 32>}, {transform_indices = @transform_3, window_bounds = array<i64: 1, 32, 32>}, {transform_indices = @transform_4, window_bounds = array<i64: 1, 32, 32>}, {transform_indices = @transform_5, window_bounds = array<i64: 1, 32, 32>}, {transform_indices = @transform_6, window_bounds = array<i64: 1, 32, 64>}, {transform_indices = @transform_7, window_bounds = array<i64: 1, 64, 32>}, {transform_indices = @transform_8, window_bounds = array<i64: 1, 9, 32>}, {transform_indices = @transform_9, window_bounds = array<i64: 1, 1, 64>}, {pipeline_mode = #tpu.pipeline_mode<synchronous>, transform_indices = @transform_10, window_bounds = array<i64: 16, 32>}, {pipeline_mode = #tpu.pipeline_mode<synchronous>, transform_indices = @transform_11, window_bounds = array<i64: 2, 8, 8>}]} {
    %c0_i32 = arith.constant 0 : i32
    %0 = arith.cmpi eq, %arg0, %c0_i32 : i32
    %1 = arith.extui %0 : i1 to i32
    %c0_i32_0 = arith.constant 0 : i32
    %2 = arith.cmpi ne, %1, %c0_i32_0 : i32
    scf.if %2 {
      %c0_118 = arith.constant 0 : index
      %c0_119 = arith.constant 0 : index
      %266 = vector.load %arg1[%c0_118, %c0_119] : memref<16x32xf32, #tpu.memory_space<vmem>>, vector<16x32xf32>
      %c0_120 = arith.constant 0 : index
      %c0_121 = arith.constant 0 : index
      %267 = vector.load %arg13[%c0_120, %c0_121] : memref<16x32xf32, #tpu.memory_space<vmem>>, vector<16x32xf32>
      tpu.vector_store %arg13[%c0_120, %c0_121], %266 {strides = array<i32>} : memref<16x32xf32, #tpu.memory_space<vmem>>, vector<16x32xf32>,
    } else {
    }
    %c0 = arith.constant 0 : index
    %c0_1 = arith.constant 0 : index
    %c0_2 = arith.constant 0 : index
    %3 = vector.load %arg3[%c0, %c0_1, %c0_2] : memref<1x32x32xf32, #tpu.memory_space<vmem>>, vector<1x32x32xf32>
    %4 = vector.shape_cast %3 : vector<1x32x32xf32> to vector<32x32xf32>
    %c0_3 = arith.constant 0 : index
    %c0_4 = arith.constant 0 : index
    %c0_5 = arith.constant 0 : index
    %5 = vector.load %arg4[%c0_3, %c0_4, %c0_5] : memref<1x32x32xf32, #tpu.memory_space<vmem>>, vector<1x32x32xf32>
    %6 = vector.shape_cast %5 : vector<1x32x32xf32> to vector<32x32xf32>
    %c0_6 = arith.constant 0 : index
    %c0_7 = arith.constant 0 : index
    %c0_8 = arith.constant 0 : index
    %7 = vector.load %arg5[%c0_6, %c0_7, %c0_8] : memref<1x32x32xf32, #tpu.memory_space<vmem>>, vector<1x32x32xf32>
    %8 = vector.shape_cast %7 : vector<1x32x32xf32> to vector<32x32xf32>
    %c0_9 = arith.constant 0 : index
    %c0_10 = arith.constant 0 : index
    %c0_11 = arith.constant 0 : index
    %9 = vector.load %arg6[%c0_9, %c0_10, %c0_11] : memref<1x32x32xf32, #tpu.memory_space<vmem>>, vector<1x32x32xf32>
    %10 = vector.shape_cast %9 : vector<1x32x32xf32> to vector<32x32xf32>
    %c0_12 = arith.constant 0 : index
    %c0_13 = arith.constant 0 : index
    %c0_14 = arith.constant 0 : index
    %11 = vector.load %arg7[%c0_12, %c0_13, %c0_14] : memref<1x32x64xf32, #tpu.memory_space<vmem>>, vector<1x32x64xf32>
    %12 = vector.shape_cast %11 : vector<1x32x64xf32> to vector<32x64xf32>
    %c0_15 = arith.constant 0 : index
    %c0_16 = arith.constant 0 : index
    %c0_17 = arith.constant 0 : index
    %13 = vector.load %arg8[%c0_15, %c0_16, %c0_17] : memref<1x64x32xf32, #tpu.memory_space<vmem>>, vector<1x64x32xf32>
    %14 = vector.shape_cast %13 : vector<1x64x32xf32> to vector<64x32xf32>
    %c0_18 = arith.constant 0 : index
    %c0_19 = arith.constant 0 : index
    %c0_20 = arith.constant 0 : index
    %15 = vector.load %arg9[%c0_18, %c0_19, %c0_20] : memref<1x9x32xf32, #tpu.memory_space<vmem>>, vector<1x9x32xf32>
    %16 = vector.shape_cast %15 : vector<1x9x32xf32> to vector<9x32xf32>
    %17 = vector.extract_strided_slice %16 {offsets = [0, 0], sizes = [1, 32], strides = [1, 1]} : vector<9x32xf32> to vector<1x32xf32>
    %18 = vector.extract_strided_slice %16 {offsets = [1, 0], sizes = [1, 32], strides = [1, 1]} : vector<9x32xf32> to vector<1x32xf32>
    %19 = vector.extract_strided_slice %16 {offsets = [2, 0], sizes = [1, 32], strides = [1, 1]} : vector<9x32xf32> to vector<1x32xf32>
    %20 = vector.extract_strided_slice %16 {offsets = [3, 0], sizes = [1, 32], strides = [1, 1]} : vector<9x32xf32> to vector<1x32xf32>
    %21 = vector.extract_strided_slice %16 {offsets = [4, 0], sizes = [1, 32], strides = [1, 1]} : vector<9x32xf32> to vector<1x32xf32>
    %22 = vector.extract_strided_slice %16 {offsets = [5, 0], sizes = [1, 32], strides = [1, 1]} : vector<9x32xf32> to vector<1x32xf32>
    %23 = vector.extract_strided_slice %16 {offsets = [6, 0], sizes = [1, 32], strides = [1, 1]} : vector<9x32xf32> to vector<1x32xf32>
    %24 = vector.extract_strided_slice %16 {offsets = [7, 0], sizes = [1, 32], strides = [1, 1]} : vector<9x32xf32> to vector<1x32xf32>
    %25 = vector.extract_strided_slice %16 {offsets = [8, 0], sizes = [1, 32], strides = [1, 1]} : vector<9x32xf32> to vector<1x32xf32>
    %c0_21 = arith.constant 0 : index
    %c0_22 = arith.constant 0 : index
    %c0_23 = arith.constant 0 : index
    %26 = vector.load %arg10[%c0_21, %c0_22, %c0_23] : memref<1x1x64xf32, #tpu.memory_space<vmem>>, vector<1x1x64xf32>
    %27 = vector.shape_cast %26 : vector<1x1x64xf32> to vector<1x64xf32>
    %c0_24 = arith.constant 0 : index
    %c0_25 = arith.constant 0 : index
    %28 = vector.load %arg13[%c0_24, %c0_25] : memref<16x32xf32, #tpu.memory_space<vmem>>, vector<16x32xf32>
    %c0_26 = arith.constant 0 : index
    %c0_27 = arith.constant 0 : index
    %29 = vector.load %arg2[%c0_26, %c0_27] : memref<16x32xf32, #tpu.memory_space<vmem>>, vector<16x32xf32>
    %30 = arith.addf %28, %29 : vector<16x32xf32>
    %cst = arith.constant dense<0.000000e+00> : vector<16x32xf32>
    %31 = tpu.matmul %30, %4, %cst {dimension_numbers = #tpu.dot_dimension_numbers<[1], [0], [0], [1], [0, 0, 1, 1], [], []>} : vector<16x32xf32>, vector<32x32xf32>, vector<16x32xf32> -> vector<16x32xf32>
    %32 = vector.broadcast %17 : vector<1x32xf32> to vector<16x32xf32>
    %33 = arith.addf %31, %32 : vector<16x32xf32>
    %cst_28 = arith.constant dense<0.000000e+00> : vector<16x32xf32>
    %34 = tpu.matmul %30, %6, %cst_28 {dimension_numbers = #tpu.dot_dimension_numbers<[1], [0], [0], [1], [0, 0, 1, 1], [], []>} : vector<16x32xf32>, vector<32x32xf32>, vector<16x32xf32> -> vector<16x32xf32>
    %35 = vector.broadcast %18 : vector<1x32xf32> to vector<16x32xf32>
    %36 = arith.addf %34, %35 : vector<16x32xf32>
    %cst_29 = arith.constant dense<0.000000e+00> : vector<16x32xf32>
    %37 = tpu.matmul %28, %8, %cst_29 {dimension_numbers = #tpu.dot_dimension_numbers<[1], [0], [0], [1], [0, 0, 1, 1], [], []>} : vector<16x32xf32>, vector<32x32xf32>, vector<16x32xf32> -> vector<16x32xf32>
    %38 = vector.broadcast %19 : vector<1x32xf32> to vector<16x32xf32>
    %39 = arith.addf %37, %38 : vector<16x32xf32>
    %40 = vector.extract_strided_slice %33 {offsets = [0, 0], sizes = [8, 8], strides = [1, 1]} : vector<16x32xf32> to vector<8x8xf32>
    %cst_30 = arith.constant 0.353553385 : f32
    %41 = vector.broadcast %cst_30 : f32 to vector<8x8xf32>
    %42 = arith.mulf %40, %41 : vector<8x8xf32>
    %43 = vector.extract_strided_slice %36 {offsets = [0, 0], sizes = [8, 8], strides = [1, 1]} : vector<16x32xf32> to vector<8x8xf32>
    %44 = vector.extract_strided_slice %39 {offsets = [0, 0], sizes = [8, 8], strides = [1, 1]} : vector<16x32xf32> to vector<8x8xf32>
    %cst_31 = arith.constant dense<0.000000e+00> : vector<8x8xf32>
    %45 = tpu.matmul %42, %43, %cst_31 {dimension_numbers = #tpu.dot_dimension_numbers<[1], [1], [0], [0], [0, 0, 1, 0], [], []>} : vector<8x8xf32>, vector<8x8xf32>, vector<8x8xf32> -> vector<8x8xf32>
    %cst_32 = arith.constant dense<0xFF800000> : vector<8xf32>
    %46 = vector.multi_reduction <maximumf>, %45, %cst_32 [1] : vector<8x8xf32> to vector<8xf32>
    %47 = vector.shape_cast %46 : vector<8xf32> to vector<8x1xf32>
    %48 = vector.broadcast %47 : vector<8x1xf32> to vector<8x8xf32>
    %49 = arith.subf %45, %48 : vector<8x8xf32>
    %50 = math.exp %49 : vector<8x8xf32>
    %cst_33 = arith.constant dense<0.000000e+00> : vector<8xf32>
    %51 = vector.multi_reduction <add>, %50, %cst_33 [1] : vector<8x8xf32> to vector<8xf32>
    %52 = vector.shape_cast %51 : vector<8xf32> to vector<8x1xf32>
    %53 = tpu.reciprocal %52 {approx = true} : vector<8x1xf32> -> vector<8x1xf32>
    %54 = vector.broadcast %53 : vector<8x1xf32> to vector<8x8xf32>
    %55 = arith.mulf %50, %54 : vector<8x8xf32>
    %cst_34 = arith.constant dense<0.000000e+00> : vector<8x8xf32>
    %56 = tpu.matmul %55, %44, %cst_34 {dimension_numbers = #tpu.dot_dimension_numbers<[1], [0], [0], [1], [0, 0, 1, 1], [], []>} : vector<8x8xf32>, vector<8x8xf32>, vector<8x8xf32> -> vector<8x8xf32>
    %c0_35 = arith.constant 0 : index
    %c0_36 = arith.constant 0 : index
    %57 = vector.load %arg14[%c0_35, %c0_36] : memref<16x32xf32, #tpu.memory_space<vmem>>, vector<8x8xf32>
    tpu.vector_store %arg14[%c0_35, %c0_36], %56 {strides = array<i32>} : memref<16x32xf32, #tpu.memory_space<vmem>>, vector<8x8xf32>,
    %c1_i32 = arith.constant 1 : i32
    %58 = arith.cmpi eq, %arg0, %c1_i32 : i32
    %59 = arith.extui %58 : i1 to i32
    %c0_i32_37 = arith.constant 0 : i32
    %60 = arith.cmpi ne, %59, %c0_i32_37 : i32
    scf.if %60 {
      %cst_118 = arith.constant 2.500000e-01 : f32
      %266 = vector.broadcast %cst_118 : f32 to vector<8x8xf32>
      %267 = arith.mulf %55, %266 : vector<8x8xf32>
      %c0_119 = arith.constant 0 : index
      %c0_120 = arith.constant 0 : index
      %c0_121 = arith.constant 0 : index
      %268 = vector.load %arg12[%c0_119, %c0_120, %c0_121] : memref<2x8x8xf32, #tpu.memory_space<vmem>>, vector<1x8x8xf32>
      %269 = vector.shape_cast %268 : vector<1x8x8xf32> to vector<8x8xf32>
      %270 = vector.shape_cast %267 : vector<8x8xf32> to vector<1x8x8xf32>
      tpu.vector_store %arg12[%c0_119, %c0_120, %c0_121], %270 {strides = array<i32>} : memref<2x8x8xf32, #tpu.memory_space<vmem>>, vector<1x8x8xf32>,
    } else {
    }
    %61 = vector.extract_strided_slice %33 {offsets = [0, 8], sizes = [8, 8], strides = [1, 1]} : vector<16x32xf32> to vector<8x8xf32>
    %cst_38 = arith.constant 0.353553385 : f32
    %62 = vector.broadcast %cst_38 : f32 to vector<8x8xf32>
    %63 = arith.mulf %61, %62 : vector<8x8xf32>
    %64 = vector.extract_strided_slice %36 {offsets = [0, 8], sizes = [8, 8], strides = [1, 1]} : vector<16x32xf32> to vector<8x8xf32>
    %65 = vector.extract_strided_slice %39 {offsets = [0, 8], sizes = [8, 8], strides = [1, 1]} : vector<16x32xf32> to vector<8x8xf32>
    %cst_39 = arith.constant dense<0.000000e+00> : vector<8x8xf32>
    %66 = tpu.matmul %63, %64, %cst_39 {dimension_numbers = #tpu.dot_dimension_numbers<[1], [1], [0], [0], [0, 0, 1, 0], [], []>} : vector<8x8xf32>, vector<8x8xf32>, vector<8x8xf32> -> vector<8x8xf32>
    %cst_40 = arith.constant dense<0xFF800000> : vector<8xf32>
    %67 = vector.multi_reduction <maximumf>, %66, %cst_40 [1] : vector<8x8xf32> to vector<8xf32>
    %68 = vector.shape_cast %67 : vector<8xf32> to vector<8x1xf32>
    %69 = vector.broadcast %68 : vector<8x1xf32> to vector<8x8xf32>
    %70 = arith.subf %66, %69 : vector<8x8xf32>
    %71 = math.exp %70 : vector<8x8xf32>
    %cst_41 = arith.constant dense<0.000000e+00> : vector<8xf32>
    %72 = vector.multi_reduction <add>, %71, %cst_41 [1] : vector<8x8xf32> to vector<8xf32>
    %73 = vector.shape_cast %72 : vector<8xf32> to vector<8x1xf32>
    %74 = tpu.reciprocal %73 {approx = true} : vector<8x1xf32> -> vector<8x1xf32>
    %75 = vector.broadcast %74 : vector<8x1xf32> to vector<8x8xf32>
    %76 = arith.mulf %71, %75 : vector<8x8xf32>
    %cst_42 = arith.constant dense<0.000000e+00> : vector<8x8xf32>
    %77 = tpu.matmul %76, %65, %cst_42 {dimension_numbers = #tpu.dot_dimension_numbers<[1], [0], [0], [1], [0, 0, 1, 1], [], []>} : vector<8x8xf32>, vector<8x8xf32>, vector<8x8xf32> -> vector<8x8xf32>
    %c0_43 = arith.constant 0 : index
    %c8 = arith.constant 8 : index
    %78 = vector.load %arg14[%c0_43, %c8] : memref<16x32xf32, #tpu.memory_space<vmem>>, vector<8x8xf32>
    tpu.vector_store %arg14[%c0_43, %c8], %77 {strides = array<i32>} : memref<16x32xf32, #tpu.memory_space<vmem>>, vector<8x8xf32>,
    %c1_i32_44 = arith.constant 1 : i32
    %79 = arith.cmpi eq, %arg0, %c1_i32_44 : i32
    %80 = arith.extui %79 : i1 to i32
    %c0_i32_45 = arith.constant 0 : i32
    %81 = arith.cmpi ne, %80, %c0_i32_45 : i32
    scf.if %81 {
      %c0_118 = arith.constant 0 : index
      %c0_119 = arith.constant 0 : index
      %c0_120 = arith.constant 0 : index
      %266 = vector.load %arg12[%c0_118, %c0_119, %c0_120] : memref<2x8x8xf32, #tpu.memory_space<vmem>>, vector<1x8x8xf32>
      %267 = vector.shape_cast %266 : vector<1x8x8xf32> to vector<8x8xf32>
      %cst_121 = arith.constant 2.500000e-01 : f32
      %268 = vector.broadcast %cst_121 : f32 to vector<8x8xf32>
      %269 = arith.mulf %76, %268 : vector<8x8xf32>
      %270 = arith.addf %267, %269 : vector<8x8xf32>
      %c0_122 = arith.constant 0 : index
      %c0_123 = arith.constant 0 : index
      %c0_124 = arith.constant 0 : index
      %271 = vector.load %arg12[%c0_122, %c0_123, %c0_124] : memref<2x8x8xf32, #tpu.memory_space<vmem>>, vector<1x8x8xf32>
      %272 = vector.shape_cast %271 : vector<1x8x8xf32> to vector<8x8xf32>
      %273 = vector.shape_cast %270 : vector<8x8xf32> to vector<1x8x8xf32>
      tpu.vector_store %arg12[%c0_122, %c0_123, %c0_124], %273 {strides = array<i32>} : memref<2x8x8xf32, #tpu.memory_space<vmem>>, vector<1x8x8xf32>,
    } else {
    }
    %82 = vector.extract_strided_slice %33 {offsets = [0, 16], sizes = [8, 8], strides = [1, 1]} : vector<16x32xf32> to vector<8x8xf32>
    %cst_46 = arith.constant 0.353553385 : f32
    %83 = vector.broadcast %cst_46 : f32 to vector<8x8xf32>
    %84 = arith.mulf %82, %83 : vector<8x8xf32>
    %85 = vector.extract_strided_slice %36 {offsets = [0, 16], sizes = [8, 8], strides = [1, 1]} : vector<16x32xf32> to vector<8x8xf32>
    %86 = vector.extract_strided_slice %39 {offsets = [0, 16], sizes = [8, 8], strides = [1, 1]} : vector<16x32xf32> to vector<8x8xf32>
    %cst_47 = arith.constant dense<0.000000e+00> : vector<8x8xf32>
    %87 = tpu.matmul %84, %85, %cst_47 {dimension_numbers = #tpu.dot_dimension_numbers<[1], [1], [0], [0], [0, 0, 1, 0], [], []>} : vector<8x8xf32>, vector<8x8xf32>, vector<8x8xf32> -> vector<8x8xf32>
    %cst_48 = arith.constant dense<0xFF800000> : vector<8xf32>
    %88 = vector.multi_reduction <maximumf>, %87, %cst_48 [1] : vector<8x8xf32> to vector<8xf32>
    %89 = vector.shape_cast %88 : vector<8xf32> to vector<8x1xf32>
    %90 = vector.broadcast %89 : vector<8x1xf32> to vector<8x8xf32>
    %91 = arith.subf %87, %90 : vector<8x8xf32>
    %92 = math.exp %91 : vector<8x8xf32>
    %cst_49 = arith.constant dense<0.000000e+00> : vector<8xf32>
    %93 = vector.multi_reduction <add>, %92, %cst_49 [1] : vector<8x8xf32> to vector<8xf32>
    %94 = vector.shape_cast %93 : vector<8xf32> to vector<8x1xf32>
    %95 = tpu.reciprocal %94 {approx = true} : vector<8x1xf32> -> vector<8x1xf32>
    %96 = vector.broadcast %95 : vector<8x1xf32> to vector<8x8xf32>
    %97 = arith.mulf %92, %96 : vector<8x8xf32>
    %cst_50 = arith.constant dense<0.000000e+00> : vector<8x8xf32>
    %98 = tpu.matmul %97, %86, %cst_50 {dimension_numbers = #tpu.dot_dimension_numbers<[1], [0], [0], [1], [0, 0, 1, 1], [], []>} : vector<8x8xf32>, vector<8x8xf32>, vector<8x8xf32> -> vector<8x8xf32>
    %c0_51 = arith.constant 0 : index
    %c16 = arith.constant 16 : index
    %99 = vector.load %arg14[%c0_51, %c16] : memref<16x32xf32, #tpu.memory_space<vmem>>, vector<8x8xf32>
    tpu.vector_store %arg14[%c0_51, %c16], %98 {strides = array<i32>} : memref<16x32xf32, #tpu.memory_space<vmem>>, vector<8x8xf32>,
    %c1_i32_52 = arith.constant 1 : i32
    %100 = arith.cmpi eq, %arg0, %c1_i32_52 : i32
    %101 = arith.extui %100 : i1 to i32
    %c0_i32_53 = arith.constant 0 : i32
    %102 = arith.cmpi ne, %101, %c0_i32_53 : i32
    scf.if %102 {
      %c0_118 = arith.constant 0 : index
      %c0_119 = arith.constant 0 : index
      %c0_120 = arith.constant 0 : index
      %266 = vector.load %arg12[%c0_118, %c0_119, %c0_120] : memref<2x8x8xf32, #tpu.memory_space<vmem>>, vector<1x8x8xf32>
      %267 = vector.shape_cast %266 : vector<1x8x8xf32> to vector<8x8xf32>
      %cst_121 = arith.constant 2.500000e-01 : f32
      %268 = vector.broadcast %cst_121 : f32 to vector<8x8xf32>
      %269 = arith.mulf %97, %268 : vector<8x8xf32>
      %270 = arith.addf %267, %269 : vector<8x8xf32>
      %c0_122 = arith.constant 0 : index
      %c0_123 = arith.constant 0 : index
      %c0_124 = arith.constant 0 : index
      %271 = vector.load %arg12[%c0_122, %c0_123, %c0_124] : memref<2x8x8xf32, #tpu.memory_space<vmem>>, vector<1x8x8xf32>
      %272 = vector.shape_cast %271 : vector<1x8x8xf32> to vector<8x8xf32>
      %273 = vector.shape_cast %270 : vector<8x8xf32> to vector<1x8x8xf32>
      tpu.vector_store %arg12[%c0_122, %c0_123, %c0_124], %273 {strides = array<i32>} : memref<2x8x8xf32, #tpu.memory_space<vmem>>, vector<1x8x8xf32>,
    } else {
    }
    %103 = vector.extract_strided_slice %33 {offsets = [0, 24], sizes = [8, 8], strides = [1, 1]} : vector<16x32xf32> to vector<8x8xf32>
    %cst_54 = arith.constant 0.353553385 : f32
    %104 = vector.broadcast %cst_54 : f32 to vector<8x8xf32>
    %105 = arith.mulf %103, %104 : vector<8x8xf32>
    %106 = vector.extract_strided_slice %36 {offsets = [0, 24], sizes = [8, 8], strides = [1, 1]} : vector<16x32xf32> to vector<8x8xf32>
    %107 = vector.extract_strided_slice %39 {offsets = [0, 24], sizes = [8, 8], strides = [1, 1]} : vector<16x32xf32> to vector<8x8xf32>
    %cst_55 = arith.constant dense<0.000000e+00> : vector<8x8xf32>
    %108 = tpu.matmul %105, %106, %cst_55 {dimension_numbers = #tpu.dot_dimension_numbers<[1], [1], [0], [0], [0, 0, 1, 0], [], []>} : vector<8x8xf32>, vector<8x8xf32>, vector<8x8xf32> -> vector<8x8xf32>
    %cst_56 = arith.constant dense<0xFF800000> : vector<8xf32>
    %109 = vector.multi_reduction <maximumf>, %108, %cst_56 [1] : vector<8x8xf32> to vector<8xf32>
    %110 = vector.shape_cast %109 : vector<8xf32> to vector<8x1xf32>
    %111 = vector.broadcast %110 : vector<8x1xf32> to vector<8x8xf32>
    %112 = arith.subf %108, %111 : vector<8x8xf32>
    %113 = math.exp %112 : vector<8x8xf32>
    %cst_57 = arith.constant dense<0.000000e+00> : vector<8xf32>
    %114 = vector.multi_reduction <add>, %113, %cst_57 [1] : vector<8x8xf32> to vector<8xf32>
    %115 = vector.shape_cast %114 : vector<8xf32> to vector<8x1xf32>
    %116 = tpu.reciprocal %115 {approx = true} : vector<8x1xf32> -> vector<8x1xf32>
    %117 = vector.broadcast %116 : vector<8x1xf32> to vector<8x8xf32>
    %118 = arith.mulf %113, %117 : vector<8x8xf32>
    %cst_58 = arith.constant dense<0.000000e+00> : vector<8x8xf32>
    %119 = tpu.matmul %118, %107, %cst_58 {dimension_numbers = #tpu.dot_dimension_numbers<[1], [0], [0], [1], [0, 0, 1, 1], [], []>} : vector<8x8xf32>, vector<8x8xf32>, vector<8x8xf32> -> vector<8x8xf32>
    %c0_59 = arith.constant 0 : index
    %c24 = arith.constant 24 : index
    %120 = vector.load %arg14[%c0_59, %c24] : memref<16x32xf32, #tpu.memory_space<vmem>>, vector<8x8xf32>
    tpu.vector_store %arg14[%c0_59, %c24], %119 {strides = array<i32>} : memref<16x32xf32, #tpu.memory_space<vmem>>, vector<8x8xf32>,
    %c1_i32_60 = arith.constant 1 : i32
    %121 = arith.cmpi eq, %arg0, %c1_i32_60 : i32
    %122 = arith.extui %121 : i1 to i32
    %c0_i32_61 = arith.constant 0 : i32
    %123 = arith.cmpi ne, %122, %c0_i32_61 : i32
    scf.if %123 {
      %c0_118 = arith.constant 0 : index
      %c0_119 = arith.constant 0 : index
      %c0_120 = arith.constant 0 : index
      %266 = vector.load %arg12[%c0_118, %c0_119, %c0_120] : memref<2x8x8xf32, #tpu.memory_space<vmem>>, vector<1x8x8xf32>
      %267 = vector.shape_cast %266 : vector<1x8x8xf32> to vector<8x8xf32>
      %cst_121 = arith.constant 2.500000e-01 : f32
      %268 = vector.broadcast %cst_121 : f32 to vector<8x8xf32>
      %269 = arith.mulf %118, %268 : vector<8x8xf32>
      %270 = arith.addf %267, %269 : vector<8x8xf32>
      %c0_122 = arith.constant 0 : index
      %c0_123 = arith.constant 0 : index
      %c0_124 = arith.constant 0 : index
      %271 = vector.load %arg12[%c0_122, %c0_123, %c0_124] : memref<2x8x8xf32, #tpu.memory_space<vmem>>, vector<1x8x8xf32>
      %272 = vector.shape_cast %271 : vector<1x8x8xf32> to vector<8x8xf32>
      %273 = vector.shape_cast %270 : vector<8x8xf32> to vector<1x8x8xf32>
      tpu.vector_store %arg12[%c0_122, %c0_123, %c0_124], %273 {strides = array<i32>} : memref<2x8x8xf32, #tpu.memory_space<vmem>>, vector<1x8x8xf32>,
    } else {
    }
    %124 = vector.extract_strided_slice %33 {offsets = [8, 0], sizes = [8, 8], strides = [1, 1]} : vector<16x32xf32> to vector<8x8xf32>
    %cst_62 = arith.constant 0.353553385 : f32
    %125 = vector.broadcast %cst_62 : f32 to vector<8x8xf32>
    %126 = arith.mulf %124, %125 : vector<8x8xf32>
    %127 = vector.extract_strided_slice %36 {offsets = [8, 0], sizes = [8, 8], strides = [1, 1]} : vector<16x32xf32> to vector<8x8xf32>
    %128 = vector.extract_strided_slice %39 {offsets = [8, 0], sizes = [8, 8], strides = [1, 1]} : vector<16x32xf32> to vector<8x8xf32>
    %cst_63 = arith.constant dense<0.000000e+00> : vector<8x8xf32>
    %129 = tpu.matmul %126, %127, %cst_63 {dimension_numbers = #tpu.dot_dimension_numbers<[1], [1], [0], [0], [0, 0, 1, 0], [], []>} : vector<8x8xf32>, vector<8x8xf32>, vector<8x8xf32> -> vector<8x8xf32>
    %cst_64 = arith.constant dense<0xFF800000> : vector<8xf32>
    %130 = vector.multi_reduction <maximumf>, %129, %cst_64 [1] : vector<8x8xf32> to vector<8xf32>
    %131 = vector.shape_cast %130 : vector<8xf32> to vector<8x1xf32>
    %132 = vector.broadcast %131 : vector<8x1xf32> to vector<8x8xf32>
    %133 = arith.subf %129, %132 : vector<8x8xf32>
    %134 = math.exp %133 : vector<8x8xf32>
    %cst_65 = arith.constant dense<0.000000e+00> : vector<8xf32>
    %135 = vector.multi_reduction <add>, %134, %cst_65 [1] : vector<8x8xf32> to vector<8xf32>
    %136 = vector.shape_cast %135 : vector<8xf32> to vector<8x1xf32>
    %137 = tpu.reciprocal %136 {approx = true} : vector<8x1xf32> -> vector<8x1xf32>
    %138 = vector.broadcast %137 : vector<8x1xf32> to vector<8x8xf32>
    %139 = arith.mulf %134, %138 : vector<8x8xf32>
    %cst_66 = arith.constant dense<0.000000e+00> : vector<8x8xf32>
    %140 = tpu.matmul %139, %128, %cst_66 {dimension_numbers = #tpu.dot_dimension_numbers<[1], [0], [0], [1], [0, 0, 1, 1], [], []>} : vector<8x8xf32>, vector<8x8xf32>, vector<8x8xf32> -> vector<8x8xf32>
    %c8_67 = arith.constant 8 : index
    %c0_68 = arith.constant 0 : index
    %141 = vector.load %arg14[%c8_67, %c0_68] : memref<16x32xf32, #tpu.memory_space<vmem>>, vector<8x8xf32>
    tpu.vector_store %arg14[%c8_67, %c0_68], %140 {strides = array<i32>} : memref<16x32xf32, #tpu.memory_space<vmem>>, vector<8x8xf32>,
    %c1_i32_69 = arith.constant 1 : i32
    %142 = arith.cmpi eq, %arg0, %c1_i32_69 : i32
    %143 = arith.extui %142 : i1 to i32
    %c0_i32_70 = arith.constant 0 : i32
    %144 = arith.cmpi ne, %143, %c0_i32_70 : i32
    scf.if %144 {
      %cst_118 = arith.constant 2.500000e-01 : f32
      %266 = vector.broadcast %cst_118 : f32 to vector<8x8xf32>
      %267 = arith.mulf %139, %266 : vector<8x8xf32>
      %c1 = arith.constant 1 : index
      %c0_119 = arith.constant 0 : index
      %c0_120 = arith.constant 0 : index
      %268 = vector.load %arg12[%c1, %c0_119, %c0_120] : memref<2x8x8xf32, #tpu.memory_space<vmem>>, vector<1x8x8xf32>
      %269 = vector.shape_cast %268 : vector<1x8x8xf32> to vector<8x8xf32>
      %270 = vector.shape_cast %267 : vector<8x8xf32> to vector<1x8x8xf32>
      tpu.vector_store %arg12[%c1, %c0_119, %c0_120], %270 {strides = array<i32>} : memref<2x8x8xf32, #tpu.memory_space<vmem>>, vector<1x8x8xf32>,
    } else {
    }
    %145 = vector.extract_strided_slice %33 {offsets = [8, 8], sizes = [8, 8], strides = [1, 1]} : vector<16x32xf32> to vector<8x8xf32>
    %cst_71 = arith.constant 0.353553385 : f32
    %146 = vector.broadcast %cst_71 : f32 to vector<8x8xf32>
    %147 = arith.mulf %145, %146 : vector<8x8xf32>
    %148 = vector.extract_strided_slice %36 {offsets = [8, 8], sizes = [8, 8], strides = [1, 1]} : vector<16x32xf32> to vector<8x8xf32>
    %149 = vector.extract_strided_slice %39 {offsets = [8, 8], sizes = [8, 8], strides = [1, 1]} : vector<16x32xf32> to vector<8x8xf32>
    %cst_72 = arith.constant dense<0.000000e+00> : vector<8x8xf32>
    %150 = tpu.matmul %147, %148, %cst_72 {dimension_numbers = #tpu.dot_dimension_numbers<[1], [1], [0], [0], [0, 0, 1, 0], [], []>} : vector<8x8xf32>, vector<8x8xf32>, vector<8x8xf32> -> vector<8x8xf32>
    %cst_73 = arith.constant dense<0xFF800000> : vector<8xf32>
    %151 = vector.multi_reduction <maximumf>, %150, %cst_73 [1] : vector<8x8xf32> to vector<8xf32>
    %152 = vector.shape_cast %151 : vector<8xf32> to vector<8x1xf32>
    %153 = vector.broadcast %152 : vector<8x1xf32> to vector<8x8xf32>
    %154 = arith.subf %150, %153 : vector<8x8xf32>
    %155 = math.exp %154 : vector<8x8xf32>
    %cst_74 = arith.constant dense<0.000000e+00> : vector<8xf32>
    %156 = vector.multi_reduction <add>, %155, %cst_74 [1] : vector<8x8xf32> to vector<8xf32>
    %157 = vector.shape_cast %156 : vector<8xf32> to vector<8x1xf32>
    %158 = tpu.reciprocal %157 {approx = true} : vector<8x1xf32> -> vector<8x1xf32>
    %159 = vector.broadcast %158 : vector<8x1xf32> to vector<8x8xf32>
    %160 = arith.mulf %155, %159 : vector<8x8xf32>
    %cst_75 = arith.constant dense<0.000000e+00> : vector<8x8xf32>
    %161 = tpu.matmul %160, %149, %cst_75 {dimension_numbers = #tpu.dot_dimension_numbers<[1], [0], [0], [1], [0, 0, 1, 1], [], []>} : vector<8x8xf32>, vector<8x8xf32>, vector<8x8xf32> -> vector<8x8xf32>
    %c8_76 = arith.constant 8 : index
    %c8_77 = arith.constant 8 : index
    %162 = vector.load %arg14[%c8_76, %c8_77] : memref<16x32xf32, #tpu.memory_space<vmem>>, vector<8x8xf32>
    tpu.vector_store %arg14[%c8_76, %c8_77], %161 {strides = array<i32>} : memref<16x32xf32, #tpu.memory_space<vmem>>, vector<8x8xf32>,
    %c1_i32_78 = arith.constant 1 : i32
    %163 = arith.cmpi eq, %arg0, %c1_i32_78 : i32
    %164 = arith.extui %163 : i1 to i32
    %c0_i32_79 = arith.constant 0 : i32
    %165 = arith.cmpi ne, %164, %c0_i32_79 : i32
    scf.if %165 {
      %c1 = arith.constant 1 : index
      %c0_118 = arith.constant 0 : index
      %c0_119 = arith.constant 0 : index
      %266 = vector.load %arg12[%c1, %c0_118, %c0_119] : memref<2x8x8xf32, #tpu.memory_space<vmem>>, vector<1x8x8xf32>
      %267 = vector.shape_cast %266 : vector<1x8x8xf32> to vector<8x8xf32>
      %cst_120 = arith.constant 2.500000e-01 : f32
      %268 = vector.broadcast %cst_120 : f32 to vector<8x8xf32>
      %269 = arith.mulf %160, %268 : vector<8x8xf32>
      %270 = arith.addf %267, %269 : vector<8x8xf32>
      %c1_121 = arith.constant 1 : index
      %c0_122 = arith.constant 0 : index
      %c0_123 = arith.constant 0 : index
      %271 = vector.load %arg12[%c1_121, %c0_122, %c0_123] : memref<2x8x8xf32, #tpu.memory_space<vmem>>, vector<1x8x8xf32>
      %272 = vector.shape_cast %271 : vector<1x8x8xf32> to vector<8x8xf32>
      %273 = vector.shape_cast %270 : vector<8x8xf32> to vector<1x8x8xf32>
      tpu.vector_store %arg12[%c1_121, %c0_122, %c0_123], %273 {strides = array<i32>} : memref<2x8x8xf32, #tpu.memory_space<vmem>>, vector<1x8x8xf32>,
    } else {
    }
    %166 = vector.extract_strided_slice %33 {offsets = [8, 16], sizes = [8, 8], strides = [1, 1]} : vector<16x32xf32> to vector<8x8xf32>
    %cst_80 = arith.constant 0.353553385 : f32
    %167 = vector.broadcast %cst_80 : f32 to vector<8x8xf32>
    %168 = arith.mulf %166, %167 : vector<8x8xf32>
    %169 = vector.extract_strided_slice %36 {offsets = [8, 16], sizes = [8, 8], strides = [1, 1]} : vector<16x32xf32> to vector<8x8xf32>
    %170 = vector.extract_strided_slice %39 {offsets = [8, 16], sizes = [8, 8], strides = [1, 1]} : vector<16x32xf32> to vector<8x8xf32>
    %cst_81 = arith.constant dense<0.000000e+00> : vector<8x8xf32>
    %171 = tpu.matmul %168, %169, %cst_81 {dimension_numbers = #tpu.dot_dimension_numbers<[1], [1], [0], [0], [0, 0, 1, 0], [], []>} : vector<8x8xf32>, vector<8x8xf32>, vector<8x8xf32> -> vector<8x8xf32>
    %cst_82 = arith.constant dense<0xFF800000> : vector<8xf32>
    %172 = vector.multi_reduction <maximumf>, %171, %cst_82 [1] : vector<8x8xf32> to vector<8xf32>
    %173 = vector.shape_cast %172 : vector<8xf32> to vector<8x1xf32>
    %174 = vector.broadcast %173 : vector<8x1xf32> to vector<8x8xf32>
    %175 = arith.subf %171, %174 : vector<8x8xf32>
    %176 = math.exp %175 : vector<8x8xf32>
    %cst_83 = arith.constant dense<0.000000e+00> : vector<8xf32>
    %177 = vector.multi_reduction <add>, %176, %cst_83 [1] : vector<8x8xf32> to vector<8xf32>
    %178 = vector.shape_cast %177 : vector<8xf32> to vector<8x1xf32>
    %179 = tpu.reciprocal %178 {approx = true} : vector<8x1xf32> -> vector<8x1xf32>
    %180 = vector.broadcast %179 : vector<8x1xf32> to vector<8x8xf32>
    %181 = arith.mulf %176, %180 : vector<8x8xf32>
    %cst_84 = arith.constant dense<0.000000e+00> : vector<8x8xf32>
    %182 = tpu.matmul %181, %170, %cst_84 {dimension_numbers = #tpu.dot_dimension_numbers<[1], [0], [0], [1], [0, 0, 1, 1], [], []>} : vector<8x8xf32>, vector<8x8xf32>, vector<8x8xf32> -> vector<8x8xf32>
    %c8_85 = arith.constant 8 : index
    %c16_86 = arith.constant 16 : index
    %183 = vector.load %arg14[%c8_85, %c16_86] : memref<16x32xf32, #tpu.memory_space<vmem>>, vector<8x8xf32>
    tpu.vector_store %arg14[%c8_85, %c16_86], %182 {strides = array<i32>} : memref<16x32xf32, #tpu.memory_space<vmem>>, vector<8x8xf32>,
    %c1_i32_87 = arith.constant 1 : i32
    %184 = arith.cmpi eq, %arg0, %c1_i32_87 : i32
    %185 = arith.extui %184 : i1 to i32
    %c0_i32_88 = arith.constant 0 : i32
    %186 = arith.cmpi ne, %185, %c0_i32_88 : i32
    scf.if %186 {
      %c1 = arith.constant 1 : index
      %c0_118 = arith.constant 0 : index
      %c0_119 = arith.constant 0 : index
      %266 = vector.load %arg12[%c1, %c0_118, %c0_119] : memref<2x8x8xf32, #tpu.memory_space<vmem>>, vector<1x8x8xf32>
      %267 = vector.shape_cast %266 : vector<1x8x8xf32> to vector<8x8xf32>
      %cst_120 = arith.constant 2.500000e-01 : f32
      %268 = vector.broadcast %cst_120 : f32 to vector<8x8xf32>
      %269 = arith.mulf %181, %268 : vector<8x8xf32>
      %270 = arith.addf %267, %269 : vector<8x8xf32>
      %c1_121 = arith.constant 1 : index
      %c0_122 = arith.constant 0 : index
      %c0_123 = arith.constant 0 : index
      %271 = vector.load %arg12[%c1_121, %c0_122, %c0_123] : memref<2x8x8xf32, #tpu.memory_space<vmem>>, vector<1x8x8xf32>
      %272 = vector.shape_cast %271 : vector<1x8x8xf32> to vector<8x8xf32>
      %273 = vector.shape_cast %270 : vector<8x8xf32> to vector<1x8x8xf32>
      tpu.vector_store %arg12[%c1_121, %c0_122, %c0_123], %273 {strides = array<i32>} : memref<2x8x8xf32, #tpu.memory_space<vmem>>, vector<1x8x8xf32>,
    } else {
    }
    %187 = vector.extract_strided_slice %33 {offsets = [8, 24], sizes = [8, 8], strides = [1, 1]} : vector<16x32xf32> to vector<8x8xf32>
    %cst_89 = arith.constant 0.353553385 : f32
    %188 = vector.broadcast %cst_89 : f32 to vector<8x8xf32>
    %189 = arith.mulf %187, %188 : vector<8x8xf32>
    %190 = vector.extract_strided_slice %36 {offsets = [8, 24], sizes = [8, 8], strides = [1, 1]} : vector<16x32xf32> to vector<8x8xf32>
    %191 = vector.extract_strided_slice %39 {offsets = [8, 24], sizes = [8, 8], strides = [1, 1]} : vector<16x32xf32> to vector<8x8xf32>
    %cst_90 = arith.constant dense<0.000000e+00> : vector<8x8xf32>
    %192 = tpu.matmul %189, %190, %cst_90 {dimension_numbers = #tpu.dot_dimension_numbers<[1], [1], [0], [0], [0, 0, 1, 0], [], []>} : vector<8x8xf32>, vector<8x8xf32>, vector<8x8xf32> -> vector<8x8xf32>
    %cst_91 = arith.constant dense<0xFF800000> : vector<8xf32>
    %193 = vector.multi_reduction <maximumf>, %192, %cst_91 [1] : vector<8x8xf32> to vector<8xf32>
    %194 = vector.shape_cast %193 : vector<8xf32> to vector<8x1xf32>
    %195 = vector.broadcast %194 : vector<8x1xf32> to vector<8x8xf32>
    %196 = arith.subf %192, %195 : vector<8x8xf32>
    %197 = math.exp %196 : vector<8x8xf32>
    %cst_92 = arith.constant dense<0.000000e+00> : vector<8xf32>
    %198 = vector.multi_reduction <add>, %197, %cst_92 [1] : vector<8x8xf32> to vector<8xf32>
    %199 = vector.shape_cast %198 : vector<8xf32> to vector<8x1xf32>
    %200 = tpu.reciprocal %199 {approx = true} : vector<8x1xf32> -> vector<8x1xf32>
    %201 = vector.broadcast %200 : vector<8x1xf32> to vector<8x8xf32>
    %202 = arith.mulf %197, %201 : vector<8x8xf32>
    %cst_93 = arith.constant dense<0.000000e+00> : vector<8x8xf32>
    %203 = tpu.matmul %202, %191, %cst_93 {dimension_numbers = #tpu.dot_dimension_numbers<[1], [0], [0], [1], [0, 0, 1, 1], [], []>} : vector<8x8xf32>, vector<8x8xf32>, vector<8x8xf32> -> vector<8x8xf32>
    %c8_94 = arith.constant 8 : index
    %c24_95 = arith.constant 24 : index
    %204 = vector.load %arg14[%c8_94, %c24_95] : memref<16x32xf32, #tpu.memory_space<vmem>>, vector<8x8xf32>
    tpu.vector_store %arg14[%c8_94, %c24_95], %203 {strides = array<i32>} : memref<16x32xf32, #tpu.memory_space<vmem>>, vector<8x8xf32>,
    %c1_i32_96 = arith.constant 1 : i32
    %205 = arith.cmpi eq, %arg0, %c1_i32_96 : i32
    %206 = arith.extui %205 : i1 to i32
    %c0_i32_97 = arith.constant 0 : i32
    %207 = arith.cmpi ne, %206, %c0_i32_97 : i32
    scf.if %207 {
      %c1 = arith.constant 1 : index
      %c0_118 = arith.constant 0 : index
      %c0_119 = arith.constant 0 : index
      %266 = vector.load %arg12[%c1, %c0_118, %c0_119] : memref<2x8x8xf32, #tpu.memory_space<vmem>>, vector<1x8x8xf32>
      %267 = vector.shape_cast %266 : vector<1x8x8xf32> to vector<8x8xf32>
      %cst_120 = arith.constant 2.500000e-01 : f32
      %268 = vector.broadcast %cst_120 : f32 to vector<8x8xf32>
      %269 = arith.mulf %202, %268 : vector<8x8xf32>
      %270 = arith.addf %267, %269 : vector<8x8xf32>
      %c1_121 = arith.constant 1 : index
      %c0_122 = arith.constant 0 : index
      %c0_123 = arith.constant 0 : index
      %271 = vector.load %arg12[%c1_121, %c0_122, %c0_123] : memref<2x8x8xf32, #tpu.memory_space<vmem>>, vector<1x8x8xf32>
      %272 = vector.shape_cast %271 : vector<1x8x8xf32> to vector<8x8xf32>
      %273 = vector.shape_cast %270 : vector<8x8xf32> to vector<1x8x8xf32>
      tpu.vector_store %arg12[%c1_121, %c0_122, %c0_123], %273 {strides = array<i32>} : memref<2x8x8xf32, #tpu.memory_space<vmem>>, vector<1x8x8xf32>,
    } else {
    }
    %c0_98 = arith.constant 0 : index
    %c0_99 = arith.constant 0 : index
    %208 = vector.load %arg14[%c0_98, %c0_99] : memref<16x32xf32, #tpu.memory_space<vmem>>, vector<16x32xf32>
    %cst_100 = arith.constant dense<0.000000e+00> : vector<16x32xf32>
    %209 = tpu.matmul %208, %10, %cst_100 {dimension_numbers = #tpu.dot_dimension_numbers<[1], [0], [0], [1], [0, 0, 1, 1], [], []>} : vector<16x32xf32>, vector<32x32xf32>, vector<16x32xf32> -> vector<16x32xf32>
    %210 = vector.broadcast %20 : vector<1x32xf32> to vector<16x32xf32>
    %211 = arith.addf %209, %210 : vector<16x32xf32>
    %212 = arith.addf %28, %211 : vector<16x32xf32>
    %cst_101 = arith.constant dense<0.000000e+00> : vector<16xf32>
    %213 = vector.multi_reduction <add>, %212, %cst_101 [1] : vector<16x32xf32> to vector<16xf32>
    %214 = vector.shape_cast %213 : vector<16xf32> to vector<16x1xf32>
    %cst_102 = arith.constant 3.200000e+01 : f32
    %215 = vector.broadcast %cst_102 : f32 to vector<16x1xf32>
    %216 = arith.divf %214, %215 : vector<16x1xf32>
    %217 = vector.broadcast %216 : vector<16x1xf32> to vector<16x32xf32>
    %218 = arith.subf %212, %217 : vector<16x32xf32>
    %219 = arith.mulf %218, %218 : vector<16x32xf32>
    %cst_103 = arith.constant dense<0.000000e+00> : vector<16xf32>
    %220 = vector.multi_reduction <add>, %219, %cst_103 [1] : vector<16x32xf32> to vector<16xf32>
    %221 = vector.shape_cast %220 : vector<16xf32> to vector<16x1xf32>
    %cst_104 = arith.constant 3.200000e+01 : f32
    %222 = vector.broadcast %cst_104 : f32 to vector<16x1xf32>
    %223 = arith.divf %221, %222 : vector<16x1xf32>
    %cst_105 = arith.constant 9.99999974E-6 : f32
    %224 = vector.broadcast %cst_105 : f32 to vector<16x1xf32>
    %225 = arith.addf %223, %224 : vector<16x1xf32>
    %226 = math.rsqrt %225 : vector<16x1xf32>
    %227 = vector.broadcast %226 : vector<16x1xf32> to vector<16x32xf32>
    %228 = arith.mulf %218, %227 : vector<16x32xf32>
    %229 = vector.broadcast %21 : vector<1x32xf32> to vector<16x32xf32>
    %230 = arith.mulf %228, %229 : vector<16x32xf32>
    %231 = vector.broadcast %22 : vector<1x32xf32> to vector<16x32xf32>
    %232 = arith.addf %230, %231 : vector<16x32xf32>
    %cst_106 = arith.constant dense<0.000000e+00> : vector<16x64xf32>
    %233 = tpu.matmul %232, %12, %cst_106 {dimension_numbers = #tpu.dot_dimension_numbers<[1], [0], [0], [1], [0, 0, 1, 1], [], []>} : vector<16x32xf32>, vector<32x64xf32>, vector<16x64xf32> -> vector<16x64xf32>
    %234 = vector.broadcast %27 : vector<1x64xf32> to vector<16x64xf32>
    %235 = arith.addf %233, %234 : vector<16x64xf32>
    %cst_107 = arith.constant 0.000000e+00 : f32
    %236 = vector.broadcast %cst_107 : f32 to vector<16x64xf32>
    %237 = arith.maximumf %235, %236 : vector<16x64xf32>
    %cst_108 = arith.constant dense<0.000000e+00> : vector<16x32xf32>
    %238 = tpu.matmul %237, %14, %cst_108 {dimension_numbers = #tpu.dot_dimension_numbers<[1], [0], [0], [1], [0, 0, 1, 1], [], []>} : vector<16x64xf32>, vector<64x32xf32>, vector<16x32xf32> -> vector<16x32xf32>
    %239 = vector.broadcast %25 : vector<1x32xf32> to vector<16x32xf32>
    %240 = arith.addf %238, %239 : vector<16x32xf32>
    %241 = arith.addf %232, %240 : vector<16x32xf32>
    %cst_109 = arith.constant dense<0.000000e+00> : vector<16xf32>
    %242 = vector.multi_reduction <add>, %241, %cst_109 [1] : vector<16x32xf32> to vector<16xf32>
    %243 = vector.shape_cast %242 : vector<16xf32> to vector<16x1xf32>
    %cst_110 = arith.constant 3.200000e+01 : f32
    %244 = vector.broadcast %cst_110 : f32 to vector<16x1xf32>
    %245 = arith.divf %243, %244 : vector<16x1xf32>
    %246 = vector.broadcast %245 : vector<16x1xf32> to vector<16x32xf32>
    %247 = arith.subf %241, %246 : vector<16x32xf32>
    %248 = arith.mulf %247, %247 : vector<16x32xf32>
    %cst_111 = arith.constant dense<0.000000e+00> : vector<16xf32>
    %249 = vector.multi_reduction <add>, %248, %cst_111 [1] : vector<16x32xf32> to vector<16xf32>
    %250 = vector.shape_cast %249 : vector<16xf32> to vector<16x1xf32>
    %cst_112 = arith.constant 3.200000e+01 : f32
    %251 = vector.broadcast %cst_112 : f32 to vector<16x1xf32>
    %252 = arith.divf %250, %251 : vector<16x1xf32>
    %cst_113 = arith.constant 9.99999974E-6 : f32
    %253 = vector.broadcast %cst_113 : f32 to vector<16x1xf32>
    %254 = arith.addf %252, %253 : vector<16x1xf32>
    %255 = math.rsqrt %254 : vector<16x1xf32>
    %256 = vector.broadcast %255 : vector<16x1xf32> to vector<16x32xf32>
    %257 = arith.mulf %247, %256 : vector<16x32xf32>
    %258 = vector.broadcast %23 : vector<1x32xf32> to vector<16x32xf32>
    %259 = arith.mulf %257, %258 : vector<16x32xf32>
    %260 = vector.broadcast %24 : vector<1x32xf32> to vector<16x32xf32>
    %261 = arith.addf %259, %260 : vector<16x32xf32>
    %c0_114 = arith.constant 0 : index
    %c0_115 = arith.constant 0 : index
    %262 = vector.load %arg13[%c0_114, %c0_115] : memref<16x32xf32, #tpu.memory_space<vmem>>, vector<16x32xf32>
    tpu.vector_store %arg13[%c0_114, %c0_115], %261 {strides = array<i32>} : memref<16x32xf32, #tpu.memory_space<vmem>>, vector<16x32xf32>,
    %c1_i32_116 = arith.constant 1 : i32
    %263 = arith.cmpi eq, %arg0, %c1_i32_116 : i32
    %264 = arith.extui %263 : i1 to i32
    %c0_i32_117 = arith.constant 0 : i32
    %265 = arith.cmpi ne, %264, %c0_i32_117 : i32
    scf.if %265 {
      %c0_118 = arith.constant 0 : index
      %c0_119 = arith.constant 0 : index
      %266 = vector.load %arg11[%c0_118, %c0_119] : memref<16x32xf32, #tpu.memory_space<vmem>>, vector<16x32xf32>
      tpu.vector_store %arg11[%c0_118, %c0_119], %261 {strides = array<i32>} : memref<16x32xf32, #tpu.memory_space<vmem>>, vector<16x32xf32>,
    } else {
    }
    return
  }
  func.func @transform_0(%arg0: i32) -> (i32, i32) {
    %c0_i32 = arith.constant 0 : i32
    %c0_i32_0 = arith.constant 0 : i32
    %c0_i32_1 = arith.constant 0 : i32
    return %c0_i32, %c0_i32_0 : i32, i32
  }
  func.func @transform_1(%arg0: i32) -> (i32, i32) {
    %c0_i32 = arith.constant 0 : i32
    %c0_i32_0 = arith.constant 0 : i32
    %c0_i32_1 = arith.constant 0 : i32
    return %c0_i32, %c0_i32_0 : i32, i32
  }
  func.func @transform_2(%arg0: i32) -> (i32, i32, i32) {
    %c0_i32 = arith.constant 0 : i32
    %c0_i32_0 = arith.constant 0 : i32
    %c0_i32_1 = arith.constant 0 : i32
    return %arg0, %c0_i32, %c0_i32_0 : i32, i32, i32
  }
  func.func @transform_3(%arg0: i32) -> (i32, i32, i32) {
    %c0_i32 = arith.constant 0 : i32
    %c0_i32_0 = arith.constant 0 : i32
    %c0_i32_1 = arith.constant 0 : i32
    return %arg0, %c0_i32, %c0_i32_0 : i32, i32, i32
  }
  func.func @transform_4(%arg0: i32) -> (i32, i32, i32) {
    %c0_i32 = arith.constant 0 : i32
    %c0_i32_0 = arith.constant 0 : i32
    %c0_i32_1 = arith.constant 0 : i32
    return %arg0, %c0_i32, %c0_i32_0 : i32, i32, i32
  }
  func.func @transform_5(%arg0: i32) -> (i32, i32, i32) {
    %c0_i32 = arith.constant 0 : i32
    %c0_i32_0 = arith.constant 0 : i32
    %c0_i32_1 = arith.constant 0 : i32
    return %arg0, %c0_i32, %c0_i32_0 : i32, i32, i32
  }
  func.func @transform_6(%arg0: i32) -> (i32, i32, i32) {
    %c0_i32 = arith.constant 0 : i32
    %c0_i32_0 = arith.constant 0 : i32
    %c0_i32_1 = arith.constant 0 : i32
    return %arg0, %c0_i32, %c0_i32_0 : i32, i32, i32
  }
  func.func @transform_7(%arg0: i32) -> (i32, i32, i32) {
    %c0_i32 = arith.constant 0 : i32
    %c0_i32_0 = arith.constant 0 : i32
    %c0_i32_1 = arith.constant 0 : i32
    return %arg0, %c0_i32, %c0_i32_0 : i32, i32, i32
  }
  func.func @transform_8(%arg0: i32) -> (i32, i32, i32) {
    %c0_i32 = arith.constant 0 : i32
    %c0_i32_0 = arith.constant 0 : i32
    %c0_i32_1 = arith.constant 0 : i32
    return %arg0, %c0_i32, %c0_i32_0 : i32, i32, i32
  }
  func.func @transform_9(%arg0: i32) -> (i32, i32, i32) {
    %c0_i32 = arith.constant 0 : i32
    %c0_i32_0 = arith.constant 0 : i32
    %c0_i32_1 = arith.constant 0 : i32
    return %arg0, %c0_i32, %c0_i32_0 : i32, i32, i32
  }
  func.func @transform_10(%arg0: i32) -> (i32, i32) {
    %c0_i32 = arith.constant 0 : i32
    %c0_i32_0 = arith.constant 0 : i32
    %c0_i32_1 = arith.constant 0 : i32
    return %c0_i32, %c0_i32_0 : i32, i32
  }
  func.func @transform_11(%arg0: i32) -> (i32, i32, i32) {
    %c0_i32 = arith.constant 0 : i32
    %c0_i32_0 = arith.constant 0 : i32
    %c0_i32_1 = arith.constant 0 : i32
    %c0_i32_2 = arith.constant 0 : i32
    return %c0_i32, %c0_i32_0, %c0_i32_1 : i32, i32, i32
  }
}

</mosaic_0001>

<bundles_post_ra>
// kernel: tpu_custom_call.1
= control target key start
LH: loop header
LB: loop body
LE: loop exit
PB: predicated region body
PF: predicated region fallthrough
CT: control target
= control target key end

     0   :  { %s3977_s0 = inlined_call_operand.vmem [shape: f32[16,32], index: 0, kind: input, shape index: {}]   ;;  %s3978_s1 = inlined_call_operand.vmem [shape: f32[16,32], index: 1, kind: input, shape index: {}]   ;;  %s3979_s2 = inlined_call_operand.vmem [shape: f32[2,32,32], index: 2, kind: input, shape index: {}]   ;;  %s3980_s3 = inlined_call_operand.vmem [shape: f32[2,32,32], index: 3, kind: input, shape index: {}]   ;;  %s3981_s4 = inlined_call_operand.vmem [shape: f32[2,32,32], index: 4, kind: input, shape index: {}]   ;;  %s3982_s5 = inlined_call_operand.hbm [shape: f32[2,32,32], index: 5, kind: input, shape index: {}]   ;;  %s3983_s6 = inlined_call_operand.hbm [shape: f32[2,32,64], index: 6, kind: input, shape index: {}]   ;;  %s3984_s7 = inlined_call_operand.vmem [shape: f32[2,64,32], index: 7, kind: input, shape index: {}]   ;;  %s3985_s8 = inlined_call_operand.vmem [shape: f32[2,9,32], index: 8, kind: input, shape index: {}]   ;;  %s3986_s9 = inlined_call_operand.vmem [shape: f32[2,1,64], index: 9, kind: input, shape index: {}]   ;;  %s3987_s10 = inlined_call_operand.hbm [shape: f32[16,32], index: 10, kind: output, shape index: {0}]   ;;  %s3988_s11 = inlined_call_operand.hbm [shape: f32[2,8,8], index: 11, kind: output, shape index: {1}]  }
   0x1   :  { %3996 = sst [smem:[#allocation20_spill]] %s3979_s2 }
   0x2   :  { %3997 = sst [smem:[#allocation21_spill]] %s3982_s5 }
   0x3   :  { %3998 = sst [smem:[#allocation22_spill]] %s3983_s6 }
   0x4   :  { %17 = vsyncpa [#allocation5], 0 }
   0x5   :  { %19 = vsyncpa [#allocation5 + $0x1], 0 }
   0x6   :  { %20 = vsyncpa [#allocation8], 0 }
   0x7   :  { %22 = vsyncpa [#allocation8 + $0x1], 0 }
   0x8   :  { %23 = vsyncpa [#allocation6], 0 }
   0x9   :  { %24 = vsyncpa [#allocation11], 0  ;;  %s3419_s17 = smov 0   ;;  %s3421_s18 = smov 0  }
   0xa   :  { %s3423_s19 = smov 0   ;;  %s3425_s20 = smov 0  }
   0xb LB: > { %3999 = sst [smem:[#allocation16_spill]] %s3334_s18  ;;  %s3438_s21 = sadd.s32 4294967295, %s3342_s20   ;;  %s3342_s20 = sphi %s3425_s20, %s4014_s20   ;;  %s3338_s19 = sphi %s3423_s19, %s4017_s19   ;;  %s3334_s18 = sphi %s3421_s18, %s4016_s18   ;;  %s3330_s17 = sphi %s3419_s17, %s4015_s17  }
   0xc   : > { %4000 = sst [smem:[#allocation17_spill]] %s3338_s19  ;;  %s3441_s22 = sadd.s32 1, %s3342_s20  }
   0xd   : > { %4001 = sst [smem:[#allocation18_spill]] %s3441_s22  ;;  %s154_s23 = ssub.s32 %s3342_s20, %s3441_s22 }
   0xe   : > { %s157_s24 = sadd.s32 1, %s3338_s19  ;;  %p155_p0 = scmp.eq.s32.totalorder %s154_s23, 0 }
   0xf   : > { %p164_p1 = scmp.ne.s32.totalorder %s3338_s19, %s3334_s18  ;;  %p165_p2 = scmp.eq.s32.totalorder %s3342_s20, 0 }
  0x10   : > { %p170_p3 = scmp.ne.s32.totalorder %s3334_s18, %s3330_s17  ;;  %p171_p5 = scmp.eq.s32.totalorder %s3438_s21, 0 }
  0x11   : > { %s3451_s25 = scalar_select %p155_p0, %s3338_s19, %s157_s24  }
  0x12   : > { %p166_p4 = por %p165_p2, %p164_p1  ;;  %p3102_p6 = scmp.lt.s32.totalorder %s3342_s20, 2 }
  0x13   : > { %4002 = sst [smem:[#allocation19_spill]] %s3451_s25  ;;  %p3455_p7 = por %p171_p5, %p170_p3 }
  0x14   : > { %s3460_s27 = sand.u32 1, %s3338_s19   ;;  %s3990_s29 = sshll.u32 %s3342_s20, 9 }
  0x15   : > { %s4003_s26 = scalar_select %p3455_p7, 1, 0 }
  0x16   : > { %s3989_s28 = sshll.u32 %s3460_s27, 5  ;;  %s4004_s5 = sld [smem:[#allocation21_spill]] }
  0x17   : > { %s374_s14 = scalar_lea.vmem [#allocation4], %s3989_s28  ;;  %p3475_p8 = pnand %p3102_p6, %p166_p4 }
  0x18   : > { %s381_s15 = sshll.u32 %s374_s14, 4  ;;  %s3473_s15 = int_to_ptr.vmem [resolvable:$true] %s381_s15 }
  0x19   : > { %p3194_p11 = pneg %p3475_p8 }
  0x1c   : > { %s3469_s13 = scalar_lea.hbm %s4004_s5, %s3990_s29  ;;  %s3197_s12 = scalar_lea.hbm %s4004_s5, 1024 }
  0x1d   : > { %s3192_s23 = scalar_lea.hbm %s3469_s13, 512  ;;  %p3198_p0 = scmp.lt.s32.totalorder %s3469_s13, %s4004_s5 }
  0x1e   : > { %p3193_p10 = scmp.ne.s32.totalorder %s3469_s13, %s3192_s23  ;;  %p3199_p1 = scmp.lt.s32.totalorder %s3197_s12, %s3192_s23 }
  0x20   : > { %p3195_p12 = pnand %p3194_p11, %p3193_p10  ;;  %p3200_p2 = por %p3199_p1, %p3198_p0 }
  0x22   : > { %p3196_p13 = pneg %p3195_p12 }
  0x24   : > { %p3201_p3 = pnand %p3200_p2, %p3196_p13 }
  0x26   : > { %3204 = shalt.err (!%p3201_p3)
}
  0x27   : > { %s3205_s29 = scalar_lea.vmem %s3473_s15, 512  ;;  %s3344_s24 = smov [#allocation4]  }
  0x28   : > { %p3206_p4 = scmp.ne.s32.totalorder %s3473_s15, %s3205_s29  ;;  %s3210_s30 = sshll.u32 %s3344_s24, 4  ;;  %s3211_s30 = int_to_ptr.vmem [resolvable:$false] %s3210_s30 }
  0x29   : > { %s3212_s17 = scalar_lea.vmem %s3211_s30, 1024  ;;  %p3213_p10 = scmp.lt.s32.totalorder %s3473_s15, %s3211_s30 }
  0x2a   : > { %p3208_p5 = pnand %p3206_p4, %p3194_p11  ;;  %p3214_p12 = scmp.lt.s32.totalorder %s3212_s17, %s3205_s29 }
  0x2c   : > { %p3209_p6 = pneg %p3208_p5  ;;  %p3215_p9 = por %p3214_p12, %p3213_p10 }
  0x2e   : > { %p3216_p0 = pnand %p3215_p9, %p3209_p6 }
  0x30   : > { %3219 = shalt.err (!%p3216_p0)
}
  0x31   : > { %s3345_s28 = smov 128   ;;  %s3346_s23 = smov 8  }
  0x32   : > { %s4006_s29 = scalar_lea.sflag [#allocation5], %s3460_s27  ;;  %p432_p9 = scmp.lt.s32.totalorder %s3342_s20, 3 }
  0x33   : > { %3098 = dma.hbm_to_vmem [thread:$0]  (!%p3475_p8), %s3469_s13, 512, %s3473_s15, %s4006_s29, %s3345_s28, %s3345_s28, %s3346_s23  }
  0x34   : > { %s4007_s17 = sshll.u32 %s3342_s20, 9  ;;  %s4008_s6 = sld [smem:[#allocation22_spill]] }
  0x35   : > { %p4009_p13 = scmp.ge.s32.totalorder %s3342_s20, 1  ;;  %s4011_s5 = sshll.u32 %s3460_s27, 5 }
  0x36   : > { %s395_s25 = scalar_lea.vmem [#allocation7], %s4011_s5  ;;  %s392_s13 = scalar_lea.sflag [#allocation8], %s3460_s27 }
  0x37   : > { %p3520_p1 = pnand %p4009_p13, %p432_p9  ;;  %s402_s19 = sshll.u32 %s395_s25, 4  ;;  %s3526_s19 = int_to_ptr.vmem [resolvable:$true] %s402_s19 }
  0x3a   : > { %s3516_s24 = scalar_lea.hbm %s4008_s6, %s4007_s17  ;;  %s3225_s17 = scalar_lea.hbm %s4008_s6, 1024 }
  0x3b   : > { %s3220_s15 = scalar_lea.hbm %s3516_s24, 512  ;;  %p3226_p5 = scmp.lt.s32.totalorder %s3516_s24, %s4008_s6 }
  0x3c   : > { %p3221_p2 = scmp.ne.s32.totalorder %s3516_s24, %s3220_s15  ;;  %p3227_p6 = scmp.lt.s32.totalorder %s3225_s17, %s3220_s15 }
  0x3e   : > { %p3223_p3 = pnand %p3221_p2, %p3194_p11  ;;  %p3228_p10 = por %p3227_p6, %p3226_p5 }
  0x40   : > { %p3224_p4 = pneg %p3223_p3 }
  0x42   : > { %p3229_p12 = pnand %p3228_p10, %p3224_p4 }
  0x44   : > { %3232 = shalt.err (!%p3229_p12)
}
  0x45   : > { %s3233_s5 = scalar_lea.vmem %s3526_s19, 512  ;;  %s3347_s25 = smov [#allocation7]  }
  0x46   : > { %p3234_p0 = scmp.ne.s32.totalorder %s3526_s19, %s3233_s5  ;;  %s3238_s27 = sshll.u32 %s3347_s25, 4  ;;  %s3239_s27 = int_to_ptr.vmem [resolvable:$false] %s3238_s27 }
  0x47   : > { %s3240_s20 = scalar_lea.vmem %s3239_s27, 1024  ;;  %p3241_p2 = scmp.lt.s32.totalorder %s3526_s19, %s3239_s27 }
  0x48   : > { %p3236_p9 = pnand %p3234_p0, %p3194_p11  ;;  %p3242_p3 = scmp.lt.s32.totalorder %s3240_s20, %s3233_s5 }
  0x4a   : > { %p3237_p13 = pneg %p3236_p9  ;;  %p3243_p7 = por %p3242_p3, %p3241_p2 }
  0x4c   : > { %p3244_p5 = pnand %p3243_p7, %p3237_p13 }
  0x4e   : > { %3247 = shalt.err (!%p3244_p5)
}
  0x4f   : > { %3101 = dma.hbm_to_vmem [thread:$0]  (!%p3475_p8), %s3516_s24, 512, %s3526_s19, %s392_s13, %s3345_s28, %s3345_s28, %s3346_s23  }
  0x50   : > { %436 = sbr.rel (%p3520_p1) target bundleno = 8623 (0x21af), region = 60  ;;  %s438_s15 = sand.u32 (!%p3520_p1), 1, %s3334_s18  }
  0x51   : > { %s2784_s29 = sshll.u32 (!%p3520_p1), %s438_s15, 5  ;;  %s439_s17 = scalar_lea.sflag (!%p3520_p1), [#allocation5], %s438_s15 }
  0x52   : > { %s442_s12 = scalar_lea.vmem (!%p3520_p1), [#allocation4], %s2784_s29  ;;  %p4012_p11 = scmp.ne.s32.totalorder (!%p3520_p1), %s4003_s26, 0 }
  0x55   : > { %3313 = dma.done.wait (%p4012_p11), %s439_s17, 512  }
  0x56   : > { %3315 = vsyncadd (%p4012_p11), %s439_s17, 4294966784  ;;  %s448_s16 = scalar_lea.sflag [#allocation8], %s438_s15  ;;  %s3561_s14 = scalar_lea.vmem [#allocation7], %s2784_s29 }
  0x57   : > { %3317 = dma.done.wait (%p4012_p11), %s448_s16, 512  }
  0x58   : > { %3319 = vsyncadd (%p4012_p11), %s448_s16, 4294966784  ;;  %p518_p7 = scmp.lt.s32.totalorder %s3438_s21, 1  ;;  %s4013_s2 = sld [smem:[#allocation20_spill]] }
  0x59   : > { %p2796_p8 = scmp.ne.s32.totalorder %s3438_s21, 0 }
  0x5a   : > { %s3569_s19 = scalar_select %p518_p7, %s3438_s21, 1 }
  0x5c   : > { %s2852_s28 = sshll.u32 %s3569_s19, 5  ;;  %s2855_s23 = sshll.u32 %s3569_s19, 6 }
  0x5d   : > { %s3581_s26 = scalar_lea.vmem %s3980_s3, %s2852_s28  ;;  %s3586_s15 = scalar_lea.vmem %s3981_s4, %s2852_s28 }
  0x5e   : > { %s3576_s13 = scalar_lea.vmem %s4013_s2, %s2852_s28  ;;  %s537_s16 = scalar_lea.vmem %s3984_s7, %s2855_s23 }
  0x5f   : > { %s2856_s6 = sshll.u32 %s3569_s19, 4  ;;  %s545_s24 = scalar_lea.vmem %s3986_s9, %s3569_s19 }
  0x60   : > { %s3599_s5 = scalar_lea.vmem %s3985_s8, %s2856_s6  ;;  %549 = sbr.rel (%p2796_p8) target bundleno = 103 (0x67), region = 72 }
  0x65   : > { %v550_v0 = vld [vmem:[%s3977_s0] sm:$0xff]  ;;  %vm552_vm0 = vcmask 261120   ;;  %v551_v1 = vld [vmem:[%s3977_s0 + $0x8] sm:$0xff] }
  0x66   : > { %553 = vst.msk [vmem:[#allocation2] sm:$0xff] %vm552_vm0, %v550_v0  ;;  %554 = vst.msk [vmem:[#allocation2 + $0x8] sm:$0xff] %vm552_vm0, %v551_v1 }
  0x67 PF: > { %v558_v2 = vld [vmem:[%s3576_s13 + $0x18] sm:$0xff]  ;;  %v3609_v3 = vld [vmem:[%s442_s12] sm:$0xff]  ;;  %v3611_v4 = vld [vmem:[%s442_s12 + $0x8] sm:$0xff]  ;;  %vm596_vm1 = vcmask 261120   ;;  %v3348_v32 = vmov 0.0   ;;  %vm3349_vm2 = vmmov 0   ;;  %v592_v33 = vlaneseq }
  0x68   : > { %v3613_v5 = vld [vmem:[%s442_s12 + $0x10] sm:$0xff]  ;;  %v3615_v6 = vld [vmem:[%s442_s12 + $0x18] sm:$0xff]  ;;  %v3618_v7 = vld [vmem:[%s3561_s14] sm:$0xff]  ;;  %2929 = vmatprep.subr.mxu1 %v558_v2  ;;  %vm843_vm3 = vcmask 64512   ;;  %p2806_p1 = scmp.ne.s32.totalorder %s3438_s21, 1 }
  0x69   : > { %v3621_v8 = vld [vmem:[%s3561_s14 + $0x8] sm:$0xff]  ;;  %v3624_v9 = vld [vmem:[%s3561_s14 + $0x10] sm:$0xff]  ;;  %v3627_v10 = vld [vmem:[%s3561_s14 + $0x18] sm:$0xff]  ;;  %2930 = vmatpush3.msra.mxu1 %v558_v2  ;;  %v3673_v34 = vshrl.u32 %v592_v33, 7 }
  0x6a   : > { %v3629_v11 = vld [vmem:[%s537_s16] sm:$0xff]  ;;  %v3631_v12 = vld [vmem:[%s537_s16 + $0x8] sm:$0xff]  ;;  %v3633_v13 = vld [vmem:[%s537_s16 + $0x10] sm:$0xff] }
  0x6b   : > { %v3635_v14 = vld [vmem:[%s537_s16 + $0x18] sm:$0xff]  ;;  %v3637_v15 = vld [vmem:[%s537_s16 + $0x20] sm:$0xff]  ;;  %v3639_v16 = vld [vmem:[%s537_s16 + $0x28] sm:$0xff]  ;;  %v594_v35 = vsub.s32 0, %v3673_v34  ;;  %v680_v40 = vsub.s32 1, %v3673_v34  ;;  %v759_v61 = vsub.s32 2, %v3673_v34 }
  0x6c   : > { %v3641_v17 = vld [vmem:[%s537_s16 + $0x30] sm:$0xff]  ;;  %v3643_v18 = vld [vmem:[%s537_s16 + $0x38] sm:$0xff]  ;;  %v556_v20 = vld [vmem:[%s3576_s13 + $0x8] sm:$0xff] }
  0x6d   : > { %v557_v19 = vld [vmem:[%s3576_s13 + $0x10] sm:$0xff]  ;;  %v555_v21 = vld [vmem:[%s3576_s13] sm:$0xff]  ;;  %v3653_v24 = vld [vmem:[#allocation2 + $0x8] sm:$0xff] }
  0x6e   : > { %2931 = vmatprep.subr.mxu1 %v557_v19  ;;  %v3648_v22 = vld [vmem:[#allocation2] sm:$0xff]  ;;  %v589_v25 = vld [vmem:[%s3978_s1 + $0x8] sm:$0xff]  ;;  %v562_v28 = vld [vmem:[%s3581_s26 + $0x18] sm:$0xff] }
  0x6f   : > { %2932 = vmatpush3.msra.mxu1 %v557_v19  ;;  %v588_v23 = vld [vmem:[%s3978_s1] sm:$0xff]  ;;  %2959 = vmatprep.mubr.msk.f32.mxu0 %vm596_vm1, %v3648_v22  ;;  %v591_v27 = vadd.f32 %v589_v25, %v3653_v24  ;;  %v561_v29 = vld [vmem:[%s3581_s26 + $0x10] sm:$0xff]  ;;  %v560_v30 = vld [vmem:[%s3581_s26 + $0x8] sm:$0xff] }
  0x70   : > { %2933 = vmatprep.subr.mxu1 %v556_v20  ;;  %v590_v26 = vadd.f32 %v588_v23, %v3648_v22  ;;  %v559_v31 = vld [vmem:[%s3581_s26] sm:$0xff]  ;;  %v566_v49 = vld [vmem:[%s3586_s15 + $0x18] sm:$0xff]  ;;  %v565_v50 = vld [vmem:[%s3586_s15 + $0x10] sm:$0xff] }
  0x71   : > { %2934 = vmatpush3.msra.mxu1 %v556_v20  ;;  %v3677_v36 = vld [vmem:[%s3599_s5] sm:$0xff]  ;;  %2951 = vmatprep.subr.mxu0 %v566_v49  ;;  %v564_v51 = vld [vmem:[%s3586_s15 + $0x8] sm:$0xff] }
  0x72   : > { %2935 = vmatprep.subr.mxu1 %v555_v21  ;;  %2937 = vmatprep.mubr.msk.f32.mxu1 %vm596_vm1, %v590_v26  ;;  %v595_v37 = vrot.slane %v3677_v36, %v594_v35  ;;  %v681_v41 = vrot.slane %v3677_v36, %v680_v40  ;;  %v563_v52 = vld [vmem:[%s3586_s15] sm:$0xff]  ;;  %v760_v63 = vrot.slane %v3677_v36, %v759_v61 }
  0x73   : > { %2936 = vmatpush3.msra.mxu1 %v555_v21  ;;  %2952 = vmatpush3.msra.mxu0 %v566_v49 }
  0x74   : > { %2938 = vmatmul.mubr.msk.f32.vlgmr.msra.gmra.mxu1 %vm596_vm1, %v591_v27  ;;  %2940 = vmatprep.subr.mxu1 %v562_v28 }
  0x75   : > { %2941 = vmatpush3.msra.mxu1 %v562_v28  ;;  %2948 = vmatprep.mubr.msk.f32.mxu1 %vm596_vm1, %v590_v26 }
  0x76   : > { %2942 = vmatprep.subr.mxu1 %v561_v29  ;;  %2953 = vmatprep.subr.mxu0 %v565_v50 }
  0x77   : > { %2943 = vmatpush3.msra.mxu1 %v561_v29  ;;  %2954 = vmatpush3.msra.mxu0 %v565_v50 }
  0x78   : > { %2944 = vmatprep.subr.mxu1 %v560_v30  ;;  %2955 = vmatprep.subr.mxu0 %v564_v51 }
  0x79   : > { %2945 = vmatpush3.msra.mxu1 %v560_v30  ;;  %2956 = vmatpush3.msra.mxu0 %v564_v51 }
  0x7a   : > { %2946 = vmatprep.subr.mxu1 %v559_v31  ;;  %2957 = vmatprep.subr.mxu0 %v563_v52 }
  0x7b   : > { %2947 = vmatpush3.msra.mxu1 %v559_v31  ;;  %2958 = vmatpush3.msra.mxu0 %v563_v52 }
  0x7c   : > { %2949 = vmatmul.mubr.msk.f32.vlgmr.msra.gmra.mxu1 %vm596_vm1, %v591_v27  ;;  %2962 = vmatprep.subr.mxu1 %v3348_v32 }
  0x7d   : > { %2964 = vmatprep.mubr.msk.f32.mxu1 %vm3349_vm2, %v3348_v32  ;;  %2960 = vmatmul.mubr.msk.f32.vlgmr.msra.gmra.mxu0 %vm596_vm1, %v3653_v24 }
 0x134   : > { %v2939_v38 = vpop.f32.mrf.mxu1 }
 0x135   : > { %v3680_v39 = vadd.f32 %v2939_v38, %v595_v37 }
 0x136   : > { %v669_v42 = vpop.f32.mrf.mxu1 }
 0x137   : > { %v670_v45 = vadd.f32 %v669_v42, %v595_v37 }
 0x139   : > { %v3690_v48 = vmul.f32 0.35355338, %v670_v45 }
 0x13c   : > { %v2950_v43 = vpop.f32.mrf.mxu1 }
 0x13d   : > { %v3684_v44 = vadd.f32 %v2950_v43, %v681_v41  ;;  %v2961_v62 = vpop.f32.mrf.mxu0 }
 0x13e   : > { %v748_v46 = vpop.f32.mrf.mxu1  ;;  %v3707_v1 = vadd.f32 %v2961_v62, %v760_v63 }
 0x13f   : > { %v3686_v47 = vadd.f32 %v748_v46, %v681_v41  ;;  %v833_v0 = vpop.f32.mrf.mxu0 }
 0x140   : > { %v3709_v2 = vadd.f32 %v833_v0, %v760_v63 }
 0x141   : > { %2963 = vmatpush3.xpose.msk.msra.mxu1 %vm843_vm3, %v3686_v47 }
 0x142   : > { %2967 = vmatprep.subr.mxu1 %v3348_v32 }
 0x144   : > { %2965 = vmatmul.mubr.msk.f32.vlgmr.msra.gmra.mxu1 %vm843_vm3, %v3690_v48 }
 0x145   : > { %2969 = vmatprep.mubr.msk.f32.mxu1 %vm3349_vm2, %v3348_v32  ;;  %2968 = vmatpush3.msra.mxu1 %v3709_v2 }
 0x204   : > { %v916_v53 = vpop.f32.mrf.mxu1 }
 0x205   : > { %v920_v54 = vsel %vm843_vm3, %v916_v53, -inf }
 0x206   : > { %921 = vmax.xlane.f32.xlu0 %v920_v54  ;;  %v2966_v55 = vpop.f32.mrf.mxu1 }
 0x28f   : > { %v922_v56 = vpop.xlane.xlu0 %921 }
 0x290   : > { %v923_v57 = vsub.f32 %v916_v53, %v922_v56 }
 0x292   : > { %v924_v58 = vmul.f32 1.442695, %v923_v57 }
 0x294   : > { %3152 = vpow2.f32 %v924_v58 }
 0x2a1   : > { %v3153_v59 = vpop.eup %3152 }
 0x2a2   : > { %v926_v60 = vsel %vm843_vm3, %v3153_v59, 0.0 }
 0x2a3   : > { %927 = vadd.xlane.f32.xlu0 %v926_v60 }
 0x32c   : > { %v928_v19 = vpop.xlane.xlu0 %927 }
 0x32d   : > { %3154 = vrcp.f32 %v928_v19 }
 0x33a   : > { %v3155_v20 = vpop.eup %3154 }
 0x33b   : > { %v930_v21 = vmul.f32 %v3155_v20, %v3153_v59 }
 0x33d   : > { %2970 = vmatmul.mubr.msk.f32.vlgmr.msra.gmra.mxu1 %vm843_vm3, %v930_v21 }
 0x3fb   : > { %1008 = sbr.rel (%p2806_p1) target bundleno = 1027 (0x403), region = 76 }
 0x3fd   : > { %v1000_v23 = vpop.f32.mrf.mxu1 }
 0x3fe   : > { %1004 = vst.msk [vmem:[#allocation3] sm:$0xff] %vm843_vm3, %v1000_v23 }
 0x3ff   : > { %v2971_v25 = vpop.f32.mrf.mxu1 }
 0x400   : > { %v1009_v26 = vmul.f32 0.25, %v930_v21 }
 0x402   : > { %1010 = vst.msk [vmem:[#allocation10] sm:$0xff] %vm843_vm3, %v1009_v26 }
 0x403 PF: > { %2972 = vmatprep.subr.mxu0 %v3348_v32  ;;  %2974 = vmatprep.mubr.msk.f32.mxu0 %vm3349_vm2, %v3348_v32  ;;  %s3350_s12 = smov 120   ;;  %s3351_s14 = smov 8   ;;  %vm1181_vm4 = vcmask 130112  }
 0x404   : > { %1013 = vrot.lane.b32.xlu0 %v3686_v47, %s3350_s12  ;;  %2977 = vmatprep.subr.mxu1 %v3348_v32 }
 0x405   : > { %2979 = vmatprep.mubr.msk.f32.mxu1 %vm3349_vm2, %v3348_v32 }
 0x408   : > { %1011 = vrot.lane.b32.xlu0 %v3690_v48, %s3350_s12 }
 0x40c   : > { %1101 = vrot.lane.b32.xlu0 %v3709_v2, %s3350_s12 }
 0x476   : > { %v1014_v27 = vpop.permute.xlu0 %1013 }
 0x477   : > { %2973 = vmatpush3.xpose.msk.msra.mxu0 %vm843_vm3, %v1014_v27 }
 0x47a   : > { %v1012_v28 = vpop.permute.xlu0 %1011 }
 0x47b   : > { %2975 = vmatmul.mubr.msk.f32.vlgmr.msra.gmra.mxu0 %vm843_vm3, %v1012_v28 }
 0x47e   : > { %v1102_v41 = vpop.permute.xlu0 %1101 }
 0x47f   : > { %2978 = vmatpush3.msra.mxu1 %v1102_v41 }
 0x53b   : > { %v1085_v29 = vpop.f32.mrf.mxu0 }
 0x53c   : > { %v1089_v30 = vsel %vm843_vm3, %v1085_v29, -inf }
 0x53d   : > { %1090 = vmax.xlane.f32.xlu1 %v1089_v30  ;;  %v2976_v31 = vpop.f32.mrf.mxu0 }
 0x5c6   : > { %v1091_v33 = vpop.xlane.xlu1 %1090 }
 0x5c7   : > { %v1092_v35 = vsub.f32 %v1085_v29, %v1091_v33 }
 0x5c9   : > { %v1093_v37 = vmul.f32 1.442695, %v1092_v35 }
 0x5cb   : > { %3156 = vpow2.f32 %v1093_v37 }
 0x5d8   : > { %v3157_v38 = vpop.eup %3156 }
 0x5d9   : > { %v1095_v40 = vsel %vm843_vm3, %v3157_v38, 0.0 }
 0x5da   : > { %1096 = vadd.xlane.f32.xlu1 %v1095_v40 }
 0x663   : > { %v1097_v42 = vpop.xlane.xlu1 %1096 }
 0x664   : > { %3158 = vrcp.f32 %v1097_v42 }
 0x671   : > { %v3159_v43 = vpop.eup %3158 }
 0x672   : > { %v1099_v45 = vmul.f32 %v3159_v43, %v3157_v38 }
 0x674   : > { %2980 = vmatmul.mubr.msk.f32.vlgmr.msra.gmra.mxu1 %vm843_vm3, %v1099_v45 }
 0x734   : > { %v1173_v46 = vpop.f32.mrf.mxu1 }
 0x735   : > { %1178 = vrot.lane.b32.xlu1 %v1173_v46, %s3351_s14 }
 0x736   : > { %v2981_v49 = vpop.f32.mrf.mxu1 }
 0x7a4   : > { %1185 = sbr.rel (%p2806_p1) target bundleno = 1966 (0x7ae), region = 80 }
 0x7a7   : > { %v1179_v50 = vpop.permute.xlu1 %1178 }
 0x7a8   : > { %1182 = vst.msk [vmem:[#allocation3] sm:$0xff] %vm1181_vm4, %v1179_v50 }
 0x7a9   : > { %v1186_v51 = vld [vmem:[#allocation10] sm:$0xff]  ;;  %v1187_v52 = vmul.f32 0.25, %v1099_v45 }
 0x7ab   : > { %v1188_v53 = vadd.f32 %v1187_v52, %v1186_v51 }
 0x7ad   : > { %1189 = vst.msk [vmem:[#allocation10] sm:$0xff] %vm843_vm3, %v1188_v53 }
 0x7ae PF: > { %2982 = vmatprep.subr.mxu0 %v3348_v32  ;;  %2984 = vmatprep.mubr.msk.f32.mxu0 %vm3349_vm2, %v3348_v32  ;;  %s3352_s13 = smov 112   ;;  %s3353_s26 = smov 16   ;;  %vm1359_vm5 = vcmask 195712  }
 0x7af   : > { %1192 = vrot.lane.b32.xlu0 %v3686_v47, %s3352_s13  ;;  %2987 = vmatprep.subr.mxu1 %v3348_v32 }
 0x7b0   : > { %2989 = vmatprep.mubr.msk.f32.mxu1 %vm3349_vm2, %v3348_v32 }
 0x7b3   : > { %1190 = vrot.lane.b32.xlu0 %v3690_v48, %s3352_s13 }
 0x7b7   : > { %1279 = vrot.lane.b32.xlu0 %v3709_v2, %s3352_s13 }
 0x821   : > { %v1193_v54 = vpop.permute.xlu0 %1192 }
 0x822   : > { %2983 = vmatpush3.xpose.msk.msra.mxu0 %vm843_vm3, %v1193_v54 }
 0x825   : > { %v1191_v55 = vpop.permute.xlu0 %1190 }
 0x826   : > { %2985 = vmatmul.mubr.msk.f32.vlgmr.msra.gmra.mxu0 %vm843_vm3, %v1191_v55 }
 0x829   : > { %v1280_v0 = vpop.permute.xlu0 %1279 }
 0x82a   : > { %2988 = vmatpush3.msra.mxu1 %v1280_v0 }
 0x8e6   : > { %v1264_v56 = vpop.f32.mrf.mxu0 }
 0x8e7   : > { %v1268_v57 = vsel %vm843_vm3, %v1264_v56, -inf }
 0x8e8   : > { %1269 = vmax.xlane.f32.xlu1 %v1268_v57  ;;  %v2986_v58 = vpop.f32.mrf.mxu0 }
 0x971   : > { %v1270_v59 = vpop.xlane.xlu1 %1269 }
 0x972   : > { %v1271_v60 = vsub.f32 %v1264_v56, %v1270_v59 }
 0x974   : > { %v1272_v61 = vmul.f32 1.442695, %v1271_v60 }
 0x976   : > { %3160 = vpow2.f32 %v1272_v61 }
 0x983   : > { %v3161_v62 = vpop.eup %3160 }
 0x984   : > { %v1274_v63 = vsel %vm843_vm3, %v3161_v62, 0.0 }
 0x985   : > { %1275 = vadd.xlane.f32.xlu1 %v1274_v63 }
 0xa0e   : > { %v1276_v19 = vpop.xlane.xlu1 %1275 }
 0xa0f   : > { %3162 = vrcp.f32 %v1276_v19 }
 0xa1c   : > { %v3163_v20 = vpop.eup %3162 }
 0xa1d   : > { %v1278_v21 = vmul.f32 %v3163_v20, %v3161_v62 }
 0xa1f   : > { %2990 = vmatmul.mubr.msk.f32.vlgmr.msra.gmra.mxu1 %vm843_vm3, %v1278_v21 }
 0xadf   : > { %v1351_v23 = vpop.f32.mrf.mxu1 }
 0xae0   : > { %1356 = vrot.lane.b32.xlu1 %v1351_v23, %s3353_s26 }
 0xae1   : > { %v2991_v25 = vpop.f32.mrf.mxu1 }
 0xb4f   : > { %1363 = sbr.rel (%p2806_p1) target bundleno = 2905 (0xb59), region = 84 }
 0xb52   : > { %v1357_v26 = vpop.permute.xlu1 %1356 }
 0xb53   : > { %1360 = vst.msk [vmem:[#allocation3] sm:$0xff] %vm1359_vm5, %v1357_v26 }
 0xb54   : > { %v1364_v27 = vld [vmem:[#allocation10] sm:$0xff]  ;;  %v1365_v28 = vmul.f32 0.25, %v1278_v21 }
 0xb56   : > { %v1366_v29 = vadd.f32 %v1365_v28, %v1364_v27 }
 0xb58   : > { %1367 = vst.msk [vmem:[#allocation10] sm:$0xff] %vm843_vm3, %v1366_v29 }
 0xb59 PF: > { %2992 = vmatprep.subr.mxu0 %v3348_v32  ;;  %2994 = vmatprep.mubr.msk.f32.mxu0 %vm3349_vm2, %v3348_v32  ;;  %s3354_s20 = smov 104   ;;  %s3355_s15 = smov 24   ;;  %vm1537_vm6 = vcmask 261312  }
 0xb5a   : > { %1370 = vrot.lane.b32.xlu0 %v3686_v47, %s3354_s20  ;;  %2997 = vmatprep.subr.mxu1 %v3348_v32 }
 0xb5b   : > { %2999 = vmatprep.mubr.msk.f32.mxu1 %vm3349_vm2, %v3348_v32 }
 0xb5e   : > { %1368 = vrot.lane.b32.xlu0 %v3690_v48, %s3354_s20 }
 0xb62   : > { %1457 = vrot.lane.b32.xlu0 %v3709_v2, %s3354_s20 }
 0xbcc   : > { %v1371_v30 = vpop.permute.xlu0 %1370 }
 0xbcd   : > { %2993 = vmatpush3.xpose.msk.msra.mxu0 %vm843_vm3, %v1371_v30 }
 0xbd0   : > { %v1369_v31 = vpop.permute.xlu0 %1368 }
 0xbd1   : > { %2995 = vmatmul.mubr.msk.f32.vlgmr.msra.gmra.mxu0 %vm843_vm3, %v1369_v31 }
 0xbd4   : > { %v1458_v2 = vpop.permute.xlu0 %1457 }
 0xbd5   : > { %2998 = vmatpush3.msra.mxu1 %v1458_v2 }
 0xc91   : > { %v1442_v33 = vpop.f32.mrf.mxu0 }
 0xc92   : > { %v1446_v47 = vsel %vm843_vm3, %v1442_v33, -inf }
 0xc93   : > { %1447 = vmax.xlane.f32.xlu1 %v1446_v47  ;;  %v2996_v35 = vpop.f32.mrf.mxu0 }
 0xd1c   : > { %v1448_v37 = vpop.xlane.xlu1 %1447 }
 0xd1d   : > { %v1449_v38 = vsub.f32 %v1442_v33, %v1448_v37 }
 0xd1f   : > { %v1450_v40 = vmul.f32 1.442695, %v1449_v38 }
 0xd21   : > { %3164 = vpow2.f32 %v1450_v40 }
 0xd2e   : > { %v3165_v41 = vpop.eup %3164 }
 0xd2f   : > { %v1452_v48 = vsel %vm843_vm3, %v3165_v41, 0.0 }
 0xd30   : > { %1453 = vadd.xlane.f32.xlu1 %v1452_v48 }
 0xdb9   : > { %v1454_v42 = vpop.xlane.xlu1 %1453 }
 0xdba   : > { %3166 = vrcp.f32 %v1454_v42 }
 0xdc7   : > { %v3167_v43 = vpop.eup %3166 }
 0xdc8   : > { %v1456_v45 = vmul.f32 %v3167_v43, %v3165_v41 }
 0xdca   : > { %3000 = vmatmul.mubr.msk.f32.vlgmr.msra.gmra.mxu1 %vm843_vm3, %v1456_v45 }
 0xe8a   : > { %v1529_v46 = vpop.f32.mrf.mxu1 }
 0xe8b   : > { %1534 = vrot.lane.b32.xlu1 %v1529_v46, %s3355_s15 }
 0xe8c   : > { %v3001_v49 = vpop.f32.mrf.mxu1 }
 0xefa   : > { %1541 = sbr.rel (%p2806_p1) target bundleno = 3844 (0xf04), region = 88 }
 0xefd   : > { %v1535_v50 = vpop.permute.xlu1 %1534 }
 0xefe   : > { %1538 = vst.msk [vmem:[#allocation3] sm:$0xff] %vm1537_vm6, %v1535_v50 }
 0xeff   : > { %v1542_v51 = vld [vmem:[#allocation10] sm:$0xff]  ;;  %v1543_v52 = vmul.f32 0.25, %v1456_v45 }
 0xf01   : > { %v1544_v53 = vadd.f32 %v1543_v52, %v1542_v51 }
 0xf03   : > { %1545 = vst.msk [vmem:[#allocation10] sm:$0xff] %vm843_vm3, %v1544_v53 }
 0xf04 PF: > { %3002 = vmatprep.subr.mxu0 %v3348_v32  ;;  %3004 = vmatprep.mubr.msk.f32.mxu0 %vm3349_vm2, %v3348_v32  ;;  %v3788_v54 = vmul.f32 0.35355338, %v3680_v39 }
 0xf05   : > { %3003 = vmatpush3.xpose.msk.msra.mxu0 %vm843_vm3, %v3684_v44  ;;  %3007 = vmatprep.subr.mxu1 %v3348_v32 }
 0xf06   : > { %3008 = vmatpush3.msra.mxu1 %v3707_v1  ;;  %3009 = vmatprep.mubr.msk.f32.mxu1 %vm3349_vm2, %v3348_v32 }
 0xf08   : > { %3005 = vmatmul.mubr.msk.f32.vlgmr.msra.gmra.mxu0 %vm843_vm3, %v3788_v54 }
 0xfc8   : > { %v1619_v55 = vpop.f32.mrf.mxu0 }
 0xfc9   : > { %v1623_v56 = vsel %vm843_vm3, %v1619_v55, -inf }
 0xfca   : > { %1624 = vmax.xlane.f32.xlu0 %v1623_v56  ;;  %v3006_v57 = vpop.f32.mrf.mxu0 }
0x1053   : > { %v1625_v39 = vpop.xlane.xlu0 %1624 }
0x1054   : > { %v1626_v58 = vsub.f32 %v1619_v55, %v1625_v39 }
0x1056   : > { %v1627_v59 = vmul.f32 1.442695, %v1626_v58 }
0x1058   : > { %3168 = vpow2.f32 %v1627_v59 }
0x1065   : > { %v3169_v60 = vpop.eup %3168 }
0x1066   : > { %v1629_v61 = vsel %vm843_vm3, %v3169_v60, 0.0 }
0x1067   : > { %1630 = vadd.xlane.f32.xlu0 %v1629_v61 }
0x10f0   : > { %v1631_v62 = vpop.xlane.xlu0 %1630 }
0x10f1   : > { %3170 = vrcp.f32 %v1631_v62 }
0x10fe   : > { %v3171_v63 = vpop.eup %3170 }
0x10ff   : > { %v1633_v0 = vmul.f32 %v3171_v63, %v3169_v60 }
0x1101   : > { %3010 = vmatmul.mubr.msk.f32.vlgmr.msra.gmra.mxu1 %vm843_vm3, %v1633_v0 }
0x11bf   : > { %1710 = sbr.rel (%p2806_p1) target bundleno = 4551 (0x11c7), region = 92 }
0x11c1   : > { %v1703_v19 = vpop.f32.mrf.mxu1 }
0x11c2   : > { %1707 = vst.msk [vmem:[#allocation3 + $0x8] sm:$0xff] %vm843_vm3, %v1703_v19 }
0x11c3   : > { %v3011_v20 = vpop.f32.mrf.mxu1 }
0x11c4   : > { %v1711_v21 = vmul.f32 0.25, %v1633_v0 }
0x11c6   : > { %1713 = vst.msk [vmem:[#allocation10 + $0x8] sm:$0xff] %vm843_vm3, %v1711_v21 }
0x11c7 PF: > { %1716 = vrot.lane.b32.xlu0 %v3684_v44, %s3350_s12  ;;  %3012 = vmatprep.subr.mxu0 %v3348_v32 }
0x11c8   : > { %3014 = vmatprep.mubr.msk.f32.mxu0 %vm3349_vm2, %v3348_v32  ;;  %3017 = vmatprep.subr.mxu1 %v3348_v32 }
0x11c9   : > { %3019 = vmatprep.mubr.msk.f32.mxu1 %vm3349_vm2, %v3348_v32 }
0x11cb   : > { %1714 = vrot.lane.b32.xlu0 %v3788_v54, %s3350_s12 }
0x11cf   : > { %1804 = vrot.lane.b32.xlu0 %v3707_v1, %s3350_s12 }
0x1239   : > { %v1717_v23 = vpop.permute.xlu0 %1716 }
0x123a   : > { %3013 = vmatpush3.xpose.msk.msra.mxu0 %vm843_vm3, %v1717_v23 }
0x123d   : > { %v1715_v25 = vpop.permute.xlu0 %1714 }
0x123e   : > { %3015 = vmatmul.mubr.msk.f32.vlgmr.msra.gmra.mxu0 %vm843_vm3, %v1715_v25 }
0x1241   : > { %v1805_v35 = vpop.permute.xlu0 %1804 }
0x1242   : > { %3018 = vmatpush3.msra.mxu1 %v1805_v35 }
0x12fe   : > { %v1788_v26 = vpop.f32.mrf.mxu0 }
0x12ff   : > { %v1792_v27 = vsel %vm843_vm3, %v1788_v26, -inf }
0x1300   : > { %1793 = vmax.xlane.f32.xlu1 %v1792_v27  ;;  %v3016_v28 = vpop.f32.mrf.mxu0 }
0x1389   : > { %v1794_v29 = vpop.xlane.xlu1 %1793 }
0x138a   : > { %v1795_v30 = vsub.f32 %v1788_v26, %v1794_v29 }
0x138c   : > { %v1796_v31 = vmul.f32 1.442695, %v1795_v30 }
0x138e   : > { %3172 = vpow2.f32 %v1796_v31 }
0x139b   : > { %v3173_v33 = vpop.eup %3172 }
0x139c   : > { %v1798_v47 = vsel %vm843_vm3, %v3173_v33, 0.0 }
0x139d   : > { %1799 = vadd.xlane.f32.xlu1 %v1798_v47 }
0x1426   : > { %v1800_v37 = vpop.xlane.xlu1 %1799 }
0x1427   : > { %3174 = vrcp.f32 %v1800_v37 }
0x1434   : > { %v3175_v38 = vpop.eup %3174 }
0x1435   : > { %v1802_v40 = vmul.f32 %v3175_v38, %v3173_v33 }
0x1437   : > { %3020 = vmatmul.mubr.msk.f32.vlgmr.msra.gmra.mxu1 %vm843_vm3, %v1802_v40 }
0x14f7   : > { %v1876_v41 = vpop.f32.mrf.mxu1 }
0x14f8   : > { %1881 = vrot.lane.b32.xlu1 %v1876_v41, %s3351_s14 }
0x14f9   : > { %v3021_v48 = vpop.f32.mrf.mxu1 }
0x1567   : > { %1887 = sbr.rel (%p2806_p1) target bundleno = 5489 (0x1571), region = 96 }
0x156a   : > { %v1882_v2 = vpop.permute.xlu1 %1881 }
0x156b   : > { %1884 = vst.msk [vmem:[#allocation3 + $0x8] sm:$0xff] %vm1181_vm4, %v1882_v2 }
0x156c   : > { %v1889_v42 = vld [vmem:[#allocation10 + $0x8] sm:$0xff]  ;;  %v1890_v43 = vmul.f32 0.25, %v1802_v40 }
0x156e   : > { %v1891_v45 = vadd.f32 %v1890_v43, %v1889_v42 }
0x1570   : > { %1892 = vst.msk [vmem:[#allocation10 + $0x8] sm:$0xff] %vm843_vm3, %v1891_v45 }
0x1571 PF: > { %1895 = vrot.lane.b32.xlu0 %v3684_v44, %s3352_s13  ;;  %3022 = vmatprep.subr.mxu0 %v3348_v32 }
0x1572   : > { %3024 = vmatprep.mubr.msk.f32.mxu0 %vm3349_vm2, %v3348_v32  ;;  %3027 = vmatprep.subr.mxu1 %v3348_v32 }
0x1573   : > { %3029 = vmatprep.mubr.msk.f32.mxu1 %vm3349_vm2, %v3348_v32 }
0x1575   : > { %1893 = vrot.lane.b32.xlu0 %v3788_v54, %s3352_s13 }
0x1579   : > { %1982 = vrot.lane.b32.xlu0 %v3707_v1, %s3352_s13 }
0x15e3   : > { %v1896_v46 = vpop.permute.xlu0 %1895 }
0x15e4   : > { %3023 = vmatpush3.xpose.msk.msra.mxu0 %vm843_vm3, %v1896_v46 }
0x15e7   : > { %v1894_v49 = vpop.permute.xlu0 %1893 }
0x15e8   : > { %3025 = vmatmul.mubr.msk.f32.vlgmr.msra.gmra.mxu0 %vm843_vm3, %v1894_v49 }
0x15eb   : > { %v1983_v58 = vpop.permute.xlu0 %1982 }
0x15ec   : > { %3028 = vmatpush3.msra.mxu1 %v1983_v58 }
0x16a8   : > { %v1967_v50 = vpop.f32.mrf.mxu0 }
0x16a9   : > { %v1971_v51 = vsel %vm843_vm3, %v1967_v50, -inf }
0x16aa   : > { %1972 = vmax.xlane.f32.xlu1 %v1971_v51  ;;  %v3026_v52 = vpop.f32.mrf.mxu0 }
0x1733   : > { %v1973_v53 = vpop.xlane.xlu1 %1972 }
0x1734   : > { %v1974_v55 = vsub.f32 %v1967_v50, %v1973_v53 }
0x1736   : > { %v1975_v56 = vmul.f32 1.442695, %v1974_v55 }
0x1738   : > { %3176 = vpow2.f32 %v1975_v56 }
0x1745   : > { %v3177_v57 = vpop.eup %3176 }
0x1746   : > { %v1977_v39 = vsel %vm843_vm3, %v3177_v57, 0.0 }
0x1747   : > { %1978 = vadd.xlane.f32.xlu1 %v1977_v39 }
0x17d0   : > { %v1979_v59 = vpop.xlane.xlu1 %1978 }
0x17d1   : > { %3178 = vrcp.f32 %v1979_v59 }
0x17de   : > { %v3179_v60 = vpop.eup %3178 }
0x17df   : > { %v1981_v61 = vmul.f32 %v3179_v60, %v3177_v57 }
0x17e1   : > { %3030 = vmatmul.mubr.msk.f32.vlgmr.msra.gmra.mxu1 %vm843_vm3, %v1981_v61 }
0x18a1   : > { %v2054_v62 = vpop.f32.mrf.mxu1 }
0x18a2   : > { %2059 = vrot.lane.b32.xlu1 %v2054_v62, %s3353_s26 }
0x18a3   : > { %v3031_v63 = vpop.f32.mrf.mxu1 }
0x1911   : > { %2065 = sbr.rel (%p2806_p1) target bundleno = 6427 (0x191b), region = 100 }
0x1914   : > { %v2060_v0 = vpop.permute.xlu1 %2059 }
0x1915   : > { %2062 = vst.msk [vmem:[#allocation3 + $0x8] sm:$0xff] %vm1359_vm5, %v2060_v0 }
0x1916   : > { %v2067_v19 = vld [vmem:[#allocation10 + $0x8] sm:$0xff]  ;;  %v2068_v20 = vmul.f32 0.25, %v1981_v61 }
0x1918   : > { %v2069_v21 = vadd.f32 %v2068_v20, %v2067_v19 }
0x191a   : > { %2070 = vst.msk [vmem:[#allocation10 + $0x8] sm:$0xff] %vm843_vm3, %v2069_v21 }
0x191b PF: > { %2073 = vrot.lane.b32.xlu0 %v3684_v44, %s3354_s20  ;;  %3032 = vmatprep.subr.mxu0 %v3348_v32 }
0x191c   : > { %3034 = vmatprep.mubr.msk.f32.mxu0 %vm3349_vm2, %v3348_v32  ;;  %3037 = vmatprep.subr.mxu1 %v3348_v32 }
0x191d   : > { %3039 = vmatprep.mubr.msk.f32.mxu1 %vm3349_vm2, %v3348_v32 }
0x191f   : > { %2071 = vrot.lane.b32.xlu0 %v3788_v54, %s3354_s20 }
0x1923   : > { %2160 = vrot.lane.b32.xlu0 %v3707_v1, %s3354_s20 }
0x198d   : > { %v2074_v23 = vpop.permute.xlu0 %2073 }
0x198e   : > { %3033 = vmatpush3.xpose.msk.msra.mxu0 %vm843_vm3, %v2074_v23 }
0x1991   : > { %v2072_v44 = vpop.permute.xlu0 %2071 }
0x1992   : > { %3035 = vmatmul.mubr.msk.f32.vlgmr.msra.gmra.mxu0 %vm843_vm3, %v2072_v44 }
0x1995   : > { %v2161_v1 = vpop.permute.xlu0 %2160 }
0x1996   : > { %3038 = vmatpush3.msra.mxu1 %v2161_v1 }
0x1a52   : > { %v2145_v25 = vpop.f32.mrf.mxu0 }
0x1a53   : > { %v2149_v26 = vsel %vm843_vm3, %v2145_v25, -inf }
0x1a54   : > { %2150 = vmax.xlane.f32.xlu1 %v2149_v26  ;;  %v3036_v27 = vpop.f32.mrf.mxu0 }
0x1add   : > { %v2151_v28 = vpop.xlane.xlu1 %2150 }
0x1ade   : > { %v2152_v29 = vsub.f32 %v2145_v25, %v2151_v28 }
0x1ae0   : > { %v2153_v32 = vmul.f32 1.442695, %v2152_v29 }
0x1ae2   : > { %3180 = vpow2.f32 %v2153_v32 }
0x1aef   : > { %v3181_v30 = vpop.eup %3180 }
0x1af0   : > { %v2155_v54 = vsel %vm843_vm3, %v3181_v30, 0.0 }
0x1af1   : > { %2156 = vadd.xlane.f32.xlu1 %v2155_v54 }
0x1b7a   : > { %v2157_v31 = vpop.xlane.xlu1 %2156 }
0x1b7b   : > { %3182 = vrcp.f32 %v2157_v31 }
0x1b88   : > { %v3183_v33 = vpop.eup %3182 }
0x1b89   : > { %v2159_v47 = vmul.f32 %v3183_v33, %v3181_v30 }
0x1b8b   : > { %3040 = vmatmul.mubr.msk.f32.vlgmr.msra.gmra.mxu1 %vm843_vm3, %v2159_v47 }
0x1c4b   : > { %v2232_v35 = vpop.f32.mrf.mxu1 }
0x1c4c   : > { %2237 = vrot.lane.b32.xlu1 %v2232_v35, %s3355_s15 }
0x1c4d   : > { %v3041_v37 = vpop.f32.mrf.mxu1 }
0x1cbb   : > { %2243 = sbr.rel (%p2806_p1) target bundleno = 7365 (0x1cc5), region = 104 }
0x1cbe   : > { %v2238_v38 = vpop.permute.xlu1 %2237 }
0x1cbf   : > { %2240 = vst.msk [vmem:[#allocation3 + $0x8] sm:$0xff] %vm1537_vm6, %v2238_v38 }
0x1cc0   : > { %v2245_v40 = vld [vmem:[#allocation10 + $0x8] sm:$0xff]  ;;  %v2246_v41 = vmul.f32 0.25, %v2159_v47 }
0x1cc2   : > { %v2247_v48 = vadd.f32 %v2246_v41, %v2245_v40 }
0x1cc4   : > { %2248 = vst.msk [vmem:[#allocation10 + $0x8] sm:$0xff] %vm843_vm3, %v2247_v48 }
0x1cc5 PF: > { %3042 = vmatprep.subr.mxu0 %v3615_v6  ;;  %v2249_v2 = vld [vmem:[#allocation3] sm:$0xff]  ;;  %3053 = vmatprep.subr.mxu1 %v3627_v10  ;;  %v2367_v55 = vsub.s32 4, %v3673_v34  ;;  %v2373_v56 = vsub.s32 5, %v3673_v34  ;;  %v2837_v20 = vld [vmem:[%s545_s24] ss:$0 sm:$0xff]  ;;  %vm2470_vm7 = vcmask 523264  }
0x1cc6   : > { %3043 = vmatpush3.msra.mxu0 %v3615_v6  ;;  %3050 = vmatprep.mubr.msk.f32.mxu0 %vm596_vm1, %v2249_v2  ;;  %v2840_v28 = vld [vmem:[%s3599_s5 + $0x8] ss:$0 sm:$0xff] }
0x1cc7   : > { %3044 = vmatprep.subr.mxu0 %v3613_v5  ;;  %3054 = vmatpush3.msra.mxu1 %v3627_v10  ;;  %v2368_v57 = vrot.slane %v3677_v36, %v2367_v55  ;;  %v2374_v59 = vrot.slane %v3677_v36, %v2373_v56 }
0x1cc8   : > { %3045 = vmatpush3.msra.mxu0 %v3613_v5  ;;  %3055 = vmatprep.subr.mxu1 %v3624_v9 }
0x1cc9   : > { %3046 = vmatprep.subr.mxu0 %v3611_v4  ;;  %3056 = vmatpush3.msra.mxu1 %v3624_v9 }
0x1cca   : > { %3047 = vmatpush3.msra.mxu0 %v3611_v4  ;;  %3057 = vmatprep.subr.mxu1 %v3621_v8 }
0x1ccb   : > { %v2250_v42 = vld [vmem:[#allocation3 + $0x8] sm:$0xff]  ;;  %3048 = vmatprep.subr.mxu0 %v3609_v3  ;;  %3058 = vmatpush3.msra.mxu1 %v3621_v8 }
0x1ccc   : > { %3049 = vmatpush3.msra.mxu0 %v3609_v3  ;;  %3059 = vmatprep.subr.mxu1 %v3618_v7  ;;  %v2253_v3 = vsub.s32 3, %v3673_v34 }
0x1ccd   : > { %3051 = vmatmul.mubr.msk.f32.vlgmr.msra.gmra.mxu0 %vm596_vm1, %v2250_v42  ;;  %3060 = vmatpush3.msra.mxu1 %v3618_v7 }
0x1cce   : > { %3064 = vmatprep.subr.mxu0 %v3643_v18  ;;  %v2254_v4 = vrot.slane %v3677_v36, %v2253_v3 }
0x1ccf   : > { %3065 = vmatpush3.msra.mxu0 %v3643_v18 }
0x1cd0   : > { %3066 = vmatprep.subr.mxu0 %v3641_v17 }
0x1cd1   : > { %3067 = vmatpush3.msra.mxu0 %v3641_v17 }
0x1cd2   : > { %3068 = vmatprep.subr.mxu0 %v3639_v16 }
0x1cd3   : > { %3069 = vmatpush3.msra.mxu0 %v3639_v16 }
0x1cd4   : > { %3070 = vmatprep.subr.mxu0 %v3637_v15 }
0x1cd5   : > { %3071 = vmatpush3.msra.mxu0 %v3637_v15 }
0x1cd6   : > { %3072 = vmatprep.subr.mxu0 %v3635_v14 }
0x1cd7   : > { %3073 = vmatpush3.msra.mxu0 %v3635_v14 }
0x1cd8   : > { %3074 = vmatprep.subr.mxu0 %v3633_v13 }
0x1cd9   : > { %3075 = vmatpush3.msra.mxu0 %v3633_v13 }
0x1cda   : > { %3076 = vmatprep.subr.mxu0 %v3631_v12 }
0x1cdb   : > { %3077 = vmatpush3.msra.mxu0 %v3631_v12 }
0x1cdc   : > { %3078 = vmatprep.subr.mxu0 %v3629_v11 }
0x1cdd   : > { %3079 = vmatpush3.msra.mxu0 %v3629_v11 }
0x1d8d   : > { %v3052_v5 = vpop.f32.mrf.mxu0 }
0x1d8e   : > { %v2333_v7 = vadd.f32 %v3052_v5, %v2254_v4 }
0x1d8f   : > { %v2327_v6 = vpop.f32.mrf.mxu0 }
0x1d90   : > { %v2328_v8 = vadd.f32 %v2327_v6, %v2254_v4  ;;  %v2337_v10 = vadd.f32 %v2333_v7, %v3653_v24 }
0x1d92   : > { %v2336_v9 = vadd.f32 %v2328_v8, %v3648_v22  ;;  %v2341_v12 = vsel %vm596_vm1, %v2337_v10, 0.0 }
0x1d94   : > { %v2338_v13 = vsel %vm596_vm1, %v2336_v9, 0.0 }
0x1d95   : > { %2339 = vadd.xlane.f32.xlu0 %v2338_v13  ;;  %v2582_v13 = vsub.s32 6, %v3673_v34 }
0x1d99   : > { %2342 = vadd.xlane.f32.xlu0 %v2341_v12  ;;  %v2588_v12 = vsub.s32 7, %v3673_v34 }
0x1e1e   : > { %v2340_v14 = vpop.xlane.xlu0 %2339 }
0x1e1f   : > { %v2345_v11 = vmul.f32 0.03125, %v2340_v14  ;;  %v2583_v14 = vrot.slane %v3677_v36, %v2582_v13 }
0x1e21   : > { %v2347_v15 = vsub.f32 %v2336_v9, %v2345_v11 }
0x1e22   : > { %v2343_v16 = vpop.xlane.xlu0 %2342 }
0x1e23   : > { %v2346_v17 = vmul.f32 0.03125, %v2343_v16  ;;  %v2349_v18 = vmul.f32 %v2347_v15, %v2347_v15 }
0x1e25   : > { %v2348_v43 = vsub.f32 %v2337_v10, %v2346_v17  ;;  %v2351_v45 = vsel %vm596_vm1, %v2349_v18, 0.0 }
0x1e26   : > { %2352 = vadd.xlane.f32.xlu1 %v2351_v45 }
0x1e27   : > { %v2350_v46 = vmul.f32 %v2348_v43, %v2348_v43 }
0x1e29   : > { %v2354_v22 = vsel %vm596_vm1, %v2350_v46, 0.0 }
0x1e2a   : > { %2355 = vadd.xlane.f32.xlu1 %v2354_v22 }
0x1eaf   : > { %v2353_v24 = vpop.xlane.xlu1 %2352 }
0x1eb0   : > { %v2357_v49 = vmul.f32 0.03125, %v2353_v24 }
0x1eb2   : > { %v2359_v50 = vadd.f32 1e-05, %v2357_v49 }
0x1eb3   : > { %v2356_v51 = vpop.xlane.xlu1 %2355 }
0x1eb4   : > { %3184 = vrsqrt.f32 %v2359_v50  ;;  %v2358_v52 = vmul.f32 0.03125, %v2356_v51 }
0x1eb6   : > { %v2360_v53 = vadd.f32 1e-05, %v2358_v52 }
0x1eb8   : > { %3186 = vrsqrt.f32 %v2360_v53 }
0x1ec1   : > { %v3185_v39 = vpop.eup %3184 }
0x1ec2   : > { %v2363_v58 = vmul.f32 %v3185_v39, %v2347_v15  ;;  %v2589_v15 = vrot.slane %v3677_v36, %v2588_v12 }
0x1ec4   : > { %v2369_v60 = vmul.f32 %v2368_v57, %v2363_v58 }
0x1ec5   : > { %v3187_v61 = vpop.eup %3186 }
0x1ec6   : > { %v2375_v62 = vadd.f32 %v2374_v59, %v2369_v60  ;;  %v2364_v63 = vmul.f32 %v3187_v61, %v2348_v43 }
0x1ec8   : > { %3061 = vmatprep.mubr.msk.f32.mxu1 %vm596_vm1, %v2375_v62  ;;  %v2370_v0 = vmul.f32 %v2368_v57, %v2364_v63 }
0x1eca   : > { %v2376_v19 = vadd.f32 %v2374_v59, %v2370_v0 }
0x1ecc   : > { %3062 = vmatmul.mubr.msk.f32.vlgmr.msra.gmra.mxu1 %vm596_vm1, %v2376_v19 }
0x1f8c   : > { %v3063_v21 = vpop.f32.mrf.mxu1 }
0x1f8d   : > { %v2461_v23 = vadd.f32 %v3063_v21, %v2837_v20 }
0x1f8e   : > { %v2455_v44 = vpop.f32.mrf.mxu1 }
0x1f8f   : > { %v2456_v25 = vadd.f32 %v2837_v20, %v2455_v44  ;;  %v2465_v27 = vmax.f32 %v2461_v23, 0.0 }
0x1f91   : > { %v2464_v26 = vmax.f32 %v2456_v25, 0.0 }
0x1f93   : > { %3080 = vmatprep.mubr.msk.f32.mxu0 %vm2470_vm7, %v2464_v26 }
0x1f94   : > { %3081 = vmatmul.mubr.msk.f32.vlgmr.msra.gmra.mxu0 %vm2470_vm7, %v2465_v27 }
0x2054   : > { %v3082_v29 = vpop.f32.mrf.mxu0 }
0x2055   : > { %v2549_v32 = vadd.f32 %v3082_v29, %v2840_v28 }
0x2056   : > { %v2543_v30 = vpop.f32.mrf.mxu0 }
0x2057   : > { %v2544_v54 = vadd.f32 %v2840_v28, %v2543_v30  ;;  %v2553_v1 = vadd.f32 %v2549_v32, %v2376_v19 }
0x2059   : > { %v2557_v31 = vsel %vm596_vm1, %v2553_v1, 0.0  ;;  %v2552_v33 = vadd.f32 %v2544_v54, %v2375_v62 }
0x205a   : > { %2558 = vadd.xlane.f32.xlu1 %v2557_v31 }
0x205b   : > { %v2554_v47 = vsel %vm596_vm1, %v2552_v33, 0.0 }
0x205c   : > { %2555 = vadd.xlane.f32.xlu0 %v2554_v47 }
0x20e3   : > { %v2559_v35 = vpop.xlane.xlu1 %2558 }
0x20e4   : > { %v2561_v37 = vmul.f32 0.03125, %v2559_v35 }
0x20e5   : > { %v2556_v38 = vpop.xlane.xlu0 %2555 }
0x20e6   : > { %v2563_v40 = vsub.f32 %v2553_v1, %v2561_v37  ;;  %v2560_v41 = vmul.f32 0.03125, %v2556_v38 }
0x20e8   : > { %v2562_v48 = vsub.f32 %v2552_v33, %v2560_v41  ;;  %v2565_v2 = vmul.f32 %v2563_v40, %v2563_v40 }
0x20ea   : > { %v2569_v42 = vsel %vm596_vm1, %v2565_v2, 0.0  ;;  %v2564_v3 = vmul.f32 %v2562_v48, %v2562_v48 }
0x20eb   : > { %2570 = vadd.xlane.f32.xlu1 %v2569_v42 }
0x20ec   : > { %v2566_v4 = vsel %vm596_vm1, %v2564_v3, 0.0 }
0x20ed   : > { %2567 = vadd.xlane.f32.xlu0 %v2566_v4 }
0x2174   : > { %v2571_v5 = vpop.xlane.xlu1 %2570 }
0x2175   : > { %v2573_v6 = vmul.f32 0.03125, %v2571_v5 }
0x2176   : > { %v2568_v7 = vpop.xlane.xlu0 %2567 }
0x2177   : > { %v2575_v8 = vadd.f32 1e-05, %v2573_v6  ;;  %v2572_v9 = vmul.f32 0.03125, %v2568_v7 }
0x2179   : > { %3188 = vrsqrt.f32 %v2575_v8  ;;  %v2574_v10 = vadd.f32 1e-05, %v2572_v9 }
0x217b   : > { %3190 = vrsqrt.f32 %v2574_v10 }
0x2186   : > { %v3189_v11 = vpop.eup %3188 }
0x2187   : > { %v2579_v16 = vmul.f32 %v3189_v11, %v2563_v40 }
0x2188   : > { %v3191_v17 = vpop.eup %3190 }
0x2189   : > { %v2585_v18 = vmul.f32 %v2583_v14, %v2579_v16  ;;  %v2578_v43 = vmul.f32 %v3191_v17, %v2562_v48 }
0x218b   : > { %v2591_v45 = vadd.f32 %v2589_v15, %v2585_v18  ;;  %v2584_v46 = vmul.f32 %v2583_v14, %v2578_v43  ;;  %2596 = sbr.rel (%p2806_p1) target bundleno = 8593 (0x2191), region = 108 }
0x218d   : > { %2593 = vst.msk [vmem:[#allocation2 + $0x8] sm:$0xff] %vm596_vm1, %v2591_v45  ;;  %v2590_v22 = vadd.f32 %v2589_v15, %v2584_v46 }
0x218f   : > { %2592 = vst.msk [vmem:[#allocation2] sm:$0xff] %vm596_vm1, %v2590_v22 }
0x2190   : > { %2597 = vst.msk [vmem:[#allocation9] sm:$0xff] %vm596_vm1, %v2590_v22  ;;  %2598 = vst.msk [vmem:[#allocation9 + $0x8] sm:$0xff] %vm596_vm1, %v2591_v45 }
0x2191 PF: > { %p3103_p4 = scmp.eq.s32.totalorder %s3438_s21, 1  ;;  %s3356_s19 = smov [#allocation9]  }
0x2192   : > { %s2605_s16 = sshll.u32 %s3356_s19, 4  ;;  %s2606_s16 = int_to_ptr.vmem [resolvable:$true] %s2605_s16 }
0x2193   : > { %s3248_s24 = scalar_lea.vmem %s2606_s16, 256  ;;  %p3255_p0 = scmp.lt.s32.totalorder %s2606_s16, %s2606_s16 }
0x2194   : > { %p3249_p6 = scmp.ne.s32.totalorder %s2606_s16, %s3248_s24  ;;  %p3256_p9 = scmp.lt.s32.totalorder %s3248_s24, %s3248_s24 }
0x2196   : > { %p3250_p10 = pnand %p3249_p6, %p3103_p4  ;;  %p3257_p13 = por %p3256_p9, %p3255_p0 }
0x2198   : > { %p3251_p12 = pneg %p3250_p10 }
0x219a   : > { %p3258_p2 = pnand %p3257_p13, %p3251_p12 }
0x219c   : > { %3261 = shalt.err (!%p3258_p2)
}
0x219d   : > { %s3357_s30 = smov 128   ;;  %s3358_s28 = smov [#allocation10]  }
0x219e   : > { %3088 = dma.vmem_to_hbm [thread:$0]  (%p3103_p4), %s2606_s16, 256, %s3987_s10, [#allocation6], %s3357_s30, %s3357_s30, %s3351_s14  }
0x219f   : > { %s2618_s27 = sshll.u32 %s3358_s28, 4  ;;  %s2619_s27 = int_to_ptr.vmem [resolvable:$true] %s2618_s27 }
0x21a0   : > { %s3272_s23 = scalar_lea.vmem %s2619_s27, 256  ;;  %p3279_p7 = scmp.lt.s32.totalorder %s2619_s27, %s2619_s27 }
0x21a1   : > { %p3273_p3 = scmp.ne.s32.totalorder %s2619_s27, %s3272_s23  ;;  %p3280_p8 = scmp.lt.s32.totalorder %s3272_s23, %s3272_s23 }
0x21a3   : > { %p3274_p5 = pnand %p3273_p3, %p3103_p4  ;;  %p3281_p1 = por %p3280_p8, %p3279_p7 }
0x21a5   : > { %p3275_p11 = pneg %p3274_p5 }
0x21a7   : > { %p3282_p6 = pnand %p3281_p1, %p3275_p11 }
0x21a9   : > { %3285 = shalt.err (!%p3282_p6)
}
0x21aa   : > { %3090 = dma.vmem_to_hbm [thread:$0]  (%p3103_p4), %s2619_s27, 256, %s3988_s11, [#allocation11], %s3357_s30, %s3357_s30, %s3351_s14  }
0x21ab   : > { %3321 = dma.done.wait (%p3103_p4), [#allocation6], 256  }
0x21ac   : > { %3323 = vsyncadd (%p3103_p4), [#allocation6], 4294967040 }
0x21ad   : > { %3325 = dma.done.wait (%p3103_p4), [#allocation11], 256  }
0x21ae   : > { %3327 = vsyncadd (%p3103_p4), [#allocation11], 4294967040 }
0x21af PF: > { %s4014_s20 = sld [smem:[#allocation18_spill]] }
0x21b0   : > { %s4015_s17 = sld [smem:[#allocation16_spill]] }
0x21b1   : > { %s4016_s18 = sld [smem:[#allocation17_spill]] }
0x21b2   : > { %s4017_s19 = sld [smem:[#allocation19_spill]] }
0x21b5   : > { %p27_p10 = scmp.ge.s32.totalorder %s4014_s20, 4  }
0x21b7   :  { %29 = sbr.rel (!%p27_p10) target bundleno = 11 (0xb), region = 180 }
0x21bc   :  { %2638 = vsyncpa [#allocation5], 1 }
0x21bd   :  { %2640 = vsyncpa [#allocation5 + $0x1], 1 }
0x21be   :  { %2641 = vsyncpa [#allocation8], 1 }
0x21bf   :  { %2643 = vsyncpa [#allocation8 + $0x1], 1 }
0x21c0   :  { %2644 = vsyncpa [#allocation6], 1 }
0x21c1   :  { %2646 = vsyncpa [#allocation6 + $0x1], 1 }
0x21c2   :  { %2647 = vsyncpa [#allocation11], 1 }

</bundles_post_ra>
